<compile_context>
chip_gen: v7x
topology: tpu7x:2x2x1
jax: 0.10.0
libtpu: 0.0.40
codegen_flags: <defaults>
</compile_context>

<pallas_src>
import functools
import math

import jax
import jax.numpy as jnp
from jax import lax
from jax.experimental import pallas as pl
from jax.experimental.pallas import tpu as pltpu

# ---------------- small RoBERTa-like config ----------------
B = 2            # batch
S = 8            # sequence length
H = 64           # hidden size
NUM_HEADS = 2
HEAD_DIM = H // NUM_HEADS
I = 128          # intermediate (FFN) size
NUM_LAYERS = 2
VOCAB = 100
MAX_POS = 32
TYPE_VOCAB = 1
NUM_LABELS = 2
PAD_IDX = 1      # RoBERTa padding_idx
LN_EPS = 1e-5

BS = B * S
WORD_PAD = ((VOCAB + 7) // 8) * 8      # sublane-aligned word-table rows
TYPE_PAD = 8

# Row layout of the coalesced "smalls" (K, 128) parameter array.
R_EMB_G, R_EMB_B = 0, 1
R_LAYER0 = 2
ROWS_PER_LAYER = 10
R_BQ, R_BK, R_BV, R_BO, R_LN1G, R_LN1B, R_B1, R_B2, R_LN2G, R_LN2B = range(10)
R_BD = R_LAYER0 + NUM_LAYERS * ROWS_PER_LAYER
R_BCLS = R_BD + 1
SMALL_ROWS = R_BCLS + 1                # 24 rows (multiple of 8)


def _layernorm(x, g, b, eps):
    mean = jnp.mean(x, axis=-1, keepdims=True)
    var = jnp.mean(jnp.square(x - mean), axis=-1, keepdims=True)
    return (x - mean) * lax.rsqrt(var + eps) * g + b


# ---------------- fused Pallas kernel ----------------

def roberta_fused_kernel(ints_ref, amask_ref, struct_ref, smalls_ref, emb_ref,
                         wqkv_ref, wo_ref, w1_ref, w2_ref, wdcls_ref,
                         logits_ref, loss_ref, *, eps):
    scale = 1.0 / math.sqrt(HEAD_DIM)

    def srow(idx, width):                       # (1, width) parameter row
        return smalls_ref[idx:idx + 1, 0:width]

    # ---- embeddings (word + position + type), all in-kernel ----
    ints = ints_ref[...]                        # (pad, 1) int32
    ids = ints[0:BS, :]                         # (B*S, 1) token ids
    lbl = ints[BS:BS + B, :]                    # (B, 1) labels
    not_pad_i = (ids != PAD_IDX).astype(jnp.int32)
    not_pad_f = not_pad_i.astype(jnp.float32)

    tri = struct_ref[0:BS, :]                   # same-batch lower-triangular
    blk = struct_ref[BS:2 * BS, :]              # same-batch block mask

    # RoBERTa position ids: cumsum of non-pad tokens per sequence + padding_idx
    pos_cnt = jnp.dot(tri, not_pad_f, preferred_element_type=jnp.float32)
    pos_ids = pos_cnt.astype(jnp.int32) * not_pad_i + PAD_IDX            # (B*S, 1)

    wiota = lax.broadcasted_iota(jnp.int32, (BS, WORD_PAD), 1)
    piota = lax.broadcasted_iota(jnp.int32, (BS, MAX_POS), 1)
    onehot_w = (wiota == ids).astype(jnp.float32)
    onehot_p = (piota == pos_ids).astype(jnp.float32)

    emb = (jnp.dot(onehot_w, emb_ref[0:WORD_PAD, :],
                   preferred_element_type=jnp.float32)
           + jnp.dot(onehot_p, emb_ref[WORD_PAD:WORD_PAD + MAX_POS, :],
                     preferred_element_type=jnp.float32)
           + emb_ref[WORD_PAD + MAX_POS:WORD_PAD + MAX_POS + 1, :])       # type id 0
    x = _layernorm(emb, srow(R_EMB_G, H), srow(R_EMB_B, H), eps)          # (B*S, H)

    # additive attention bias: same sequence AND key not padded, else -1e9
    key_valid = amask_ref[...]                                            # (1, B*S)
    attn_bias = jnp.where((blk > 0.5) & (key_valid > 0.5), 0.0, -1e9)     # (B*S, B*S)

    # ---- encoder layers (static unroll; move to fori_loop/grid if layers grow) ----
    for li in range(NUM_LAYERS):
        base = R_LAYER0 + li * ROWS_PER_LAYER
        # fused QKV: one matmul, static lane slices
        qkv = jnp.dot(x, wqkv_ref[li], preferred_element_type=jnp.float32)  # (B*S, 3H)
        q_all = qkv[:, 0 * H:1 * H] + srow(base + R_BQ, H)
        k_all = qkv[:, 1 * H:2 * H] + srow(base + R_BK, H)
        v_all = qkv[:, 2 * H:3 * H] + srow(base + R_BV, H)
        wo_l = wo_ref[li]                                                   # (H, H)

        acc = None
        for h in range(NUM_HEADS):                                          # static
            sl = slice(h * HEAD_DIM, (h + 1) * HEAD_DIM)
            qh, kh, vh = q_all[:, sl], k_all[:, sl], v_all[:, sl]
            # q @ k^T without explicit transpose (contract dim 1 of both)
            scores = lax.dot_general(
                qh, kh, (((1,), (1,)), ((), ())),
                preferred_element_type=jnp.float32) * scale + attn_bias
            m = jnp.max(scores, axis=-1, keepdims=True)
            e = jnp.exp(scores - m)
            p = e * pl.reciprocal(jnp.sum(e, axis=-1, keepdims=True), approx=True)
            ctx = jnp.dot(p, vh, preferred_element_type=jnp.float32)        # (B*S, HD)
            contrib = jnp.dot(ctx, wo_l[sl, :],
                              preferred_element_type=jnp.float32)           # (B*S, H)
            acc = contrib if acc is None else acc + contrib
        attn = acc + srow(base + R_BO, H)
        h1 = _layernorm(attn + x, srow(base + R_LN1G, H),
                        srow(base + R_LN1B, H), eps)
        # TODO(synk): HF RoBERTa uses exact (erf) GELU; tanh approximation used here.
        inter = jax.nn.gelu(
            jnp.dot(h1, w1_ref[li], preferred_element_type=jnp.float32)
            + srow(base + R_B1, I), approximate=True)
        ffn = (jnp.dot(inter, w2_ref[li], preferred_element_type=jnp.float32)
               + srow(base + R_B2, H))
        x = _layernorm(ffn + h1, srow(base + R_LN2G, H),
                       srow(base + R_LN2B, H), eps)

    # ---- classification head on the <s> token (static sublane slices) ----
    cls = jnp.concatenate([x[b * S:b * S + 1, :] for b in range(B)], axis=0)  # (B, H)
    wdcls = wdcls_ref[...]                                                # (H, H + L)
    hcls = jnp.tanh(jnp.dot(cls, wdcls[:, 0:H],
                            preferred_element_type=jnp.float32) + srow(R_BD, H))
    logits = (jnp.dot(hcls, wdcls[:, H:H + NUM_LABELS],
                      preferred_element_type=jnp.float32)
              + srow(R_BCLS, NUM_LABELS))                                 # (B, L)

    # ---- CrossEntropyLoss (mean over batch), label one-hot built in-kernel ----
    liota = lax.broadcasted_iota(jnp.int32, (B, NUM_LABELS), 1)
    onehot_l = (liota == lbl).astype(jnp.float32)
    m = jnp.max(logits, axis=-1, keepdims=True)
    lse = m + jnp.log(jnp.sum(jnp.exp(logits - m), axis=-1, keepdims=True))
    loss = -jnp.sum(onehot_l * (logits - lse)) / B

    logits_ref[...] = logits
    loss_ref[...] = jnp.broadcast_to(loss, (1, 1))


# ---------------- wrapper: pack params + single pallas_call ----------------

def pack_params(params):
    """Fuse per-layer weights and coalesce all 1-row tensors for few, large DMAs."""
    def row128(v):
        v = v.reshape(-1).astype(jnp.float32)
        return jnp.zeros((128,), jnp.float32).at[:v.shape[0]].set(v)

    rows = [row128(params["emb_ln_g"]), row128(params["emb_ln_b"])]
    wqkv, wo, w1, w2 = [], [], [], []
    for lp in params["layers"]:
        rows += [row128(lp["bq"]), row128(lp["bk"]), row128(lp["bv"]),
                 row128(lp["bo"]), row128(lp["ln1_g"]), row128(lp["ln1_b"]),
                 row128(lp["b1"]), row128(lp["b2"]),
                 row128(lp["ln2_g"]), row128(lp["ln2_b"])]
        wqkv.append(jnp.concatenate([lp["wq"], lp["wk"], lp["wv"]], axis=1))  # (H,3H)
        wo.append(lp["wo"])
        w1.append(lp["w1"]); w2.append(lp["w2"])
    rows += [row128(params["cls"]["bd"]), row128(params["cls"]["bo"])]
    smalls = jnp.stack(rows)                                    # (SMALL_ROWS, 128)
    assert smalls.shape[0] == SMALL_ROWS

    word_tab = jnp.zeros((WORD_PAD, H), jnp.float32).at[:VOCAB].set(params["word_emb"])
    type_tab = jnp.zeros((TYPE_PAD, H), jnp.float32).at[:TYPE_VOCAB].set(params["type_emb"])
    emb_tables = jnp.concatenate([word_tab, params["pos_emb"], type_tab], axis=0)

    # static block structure of the flattened (B*S) token axis
    r = jnp.arange(BS)
    same = (r[:, None] // S) == (r[None, :] // S)
    tri = (same & (r[None, :] <= r[:, None])).astype(jnp.float32)   # for cumsum
    blk = same.astype(jnp.float32)                                  # for attention
    struct = jnp.concatenate([tri, blk], axis=0)                    # (2*B*S, B*S)

    return {
        "smalls": smalls,
        "emb_tables": emb_tables,                 # (WORD_PAD + MAX_POS + TYPE_PAD, H)
        "struct": struct,
        "wqkv": jnp.stack(wqkv),                  # (L, H, 3H)
        "wo": jnp.stack(wo),                      # (L, H, H)
        "w1": jnp.stack(w1),                      # (L, H, I)
        "w2": jnp.stack(w2),                      # (L, I, H)
        "wdcls": jnp.concatenate([params["cls"]["wd"], params["cls"]["wo"]], axis=1),
    }


def roberta_forward(packed, input_ids, attention_mask, labels):
    # tiny integer sideband: token ids followed by labels, sublane-padded
    n = BS + B
    pad = (-n) % 8
    ints = jnp.concatenate([input_ids.reshape(-1).astype(jnp.int32),
                            labels.reshape(-1).astype(jnp.int32),
                            jnp.zeros((pad,), jnp.int32)]).reshape(-1, 1)
    amask = attention_mask.reshape(1, -1).astype(jnp.float32)          # (1, B*S)

    vmem = pl.BlockSpec(memory_space=pltpu.MemorySpace.VMEM)           # whole array
    logits, loss = pl.pallas_call(
        functools.partial(roberta_fused_kernel, eps=LN_EPS),
        out_shape=(jax.ShapeDtypeStruct((B, NUM_LABELS), jnp.float32),
                   jax.ShapeDtypeStruct((1, 1), jnp.float32)),
        in_specs=[vmem] * 10,
        out_specs=(vmem, vmem),
    )(ints, amask, packed["struct"], packed["smalls"], packed["emb_tables"],
      packed["wqkv"], packed["wo"], packed["w1"], packed["w2"], packed["wdcls"])
    # nn.Dropout layers -> identity (eval-mode semantics)
    return logits, loss[0, 0]


# ---------------- deterministic synthetic parameters ----------------

def init_params(key):
    def nrm(k, shape, scale=0.02):
        return scale * jax.random.normal(k, shape, dtype=jnp.float32)

    keys = jax.random.split(key, 4 + NUM_LAYERS)
    params = {
        "word_emb": nrm(keys[0], (VOCAB, H)),
        "pos_emb": nrm(keys[1], (MAX_POS, H)),
        "type_emb": nrm(keys[2], (TYPE_VOCAB, H)),
        "emb_ln_g": jnp.ones((1, H), jnp.float32),
        "emb_ln_b": jnp.zeros((1, H), jnp.float32),
    }
    layers = []
    for li in range(NUM_LAYERS):
        lk = jax.random.split(keys[3 + li], 12)
        layers.append({
            "wq": nrm(lk[0], (H, H)), "bq": nrm(lk[1], (1, H)),
            "wk": nrm(lk[2], (H, H)), "bk": nrm(lk[3], (1, H)),
            "wv": nrm(lk[4], (H, H)), "bv": nrm(lk[5], (1, H)),
            "wo": nrm(lk[6], (H, H)), "bo": nrm(lk[7], (1, H)),
            "ln1_g": jnp.ones((1, H), jnp.float32),
            "ln1_b": jnp.zeros((1, H), jnp.float32),
            "w1": nrm(lk[8], (H, I)), "b1": nrm(lk[9], (1, I)),
            "w2": nrm(lk[10], (I, H)), "b2": nrm(lk[11], (1, H)),
            "ln2_g": jnp.ones((1, H), jnp.float32),
            "ln2_b": jnp.zeros((1, H), jnp.float32),
        })
    params["layers"] = layers
    ck = jax.random.split(keys[3 + NUM_LAYERS], 4)
    params["cls"] = {
        "wd": nrm(ck[0], (H, H)), "bd": nrm(ck[1], (1, H)),
        "wo": nrm(ck[2], (H, NUM_LABELS)), "bo": nrm(ck[3], (1, NUM_LABELS)),
    }
    return params


# ---------------- pure-JAX reference (for verification only) ----------------

def reference_forward(params, input_ids, attention_mask, labels):
    not_pad = (input_ids != PAD_IDX).astype(jnp.int32)
    position_ids = jnp.cumsum(not_pad, axis=1) * not_pad + PAD_IDX
    we = params["word_emb"][input_ids]
    pe = params["pos_emb"][position_ids]
    te = params["type_emb"][jnp.zeros_like(input_ids)]
    x = _layernorm(we + pe + te, params["emb_ln_g"][0], params["emb_ln_b"][0], LN_EPS)
    amask = ((1.0 - attention_mask.astype(jnp.float32)) * -1e9)[:, None, None, :]
    for lp in params["layers"]:
        q = x @ lp["wq"] + lp["bq"][0]
        k = x @ lp["wk"] + lp["bk"][0]
        v = x @ lp["wv"] + lp["bv"][0]
        split = lambda t: t.reshape(B, S, NUM_HEADS, HEAD_DIM).transpose(0, 2, 1, 3)
        qh, kh, vh = split(q), split(k), split(v)
        scores = jnp.einsum("bhqd,bhkd->bhqk", qh, kh) / math.sqrt(HEAD_DIM) + amask
        p = jax.nn.softmax(scores, axis=-1)
        ctx = jnp.einsum("bhqk,bhkd->bhqd", p, vh).transpose(0, 2, 1, 3).reshape(B, S, H)
        attn = ctx @ lp["wo"] + lp["bo"][0]
        h1 = _layernorm(attn + x, lp["ln1_g"][0], lp["ln1_b"][0], LN_EPS)
        # TODO(synk): tanh-approx GELU here to match the kernel (HF uses exact erf).
        inter = jax.nn.gelu(h1 @ lp["w1"] + lp["b1"][0], approximate=True)
        x = _layernorm(inter @ lp["w2"] + lp["b2"][0] + h1,
                       lp["ln2_g"][0], lp["ln2_b"][0], LN_EPS)
    cp = params["cls"]
    cls_feat = x[:, 0, :]
    logits = jnp.tanh(cls_feat @ cp["wd"] + cp["bd"][0]) @ cp["wo"] + cp["bo"][0]
    logp = jax.nn.log_softmax(logits, axis=-1)
    loss = -jnp.mean(jnp.take_along_axis(logp, labels[:, None], axis=1))
    return logits, loss


if __name__ == "__main__":
    key = jax.random.PRNGKey(0)
    pkey, dkey, lkey = jax.random.split(key, 3)
    params = init_params(pkey)
    packed = pack_params(params)

    input_ids = jax.random.randint(dkey, (B, S), 2, VOCAB, dtype=jnp.int32)
    input_ids = input_ids.at[1, -2:].set(PAD_IDX)            # pad tail of 2nd sequence
    attention_mask = (input_ids != PAD_IDX).astype(jnp.int32)
    labels = jax.random.randint(lkey, (B,), 0, NUM_LABELS, dtype=jnp.int32)

    fwd = jax.jit(roberta_forward)
    logits, loss = fwd(packed, input_ids, attention_mask, labels)
    (logits, loss) = jax.block_until_ready((logits, loss))

    ref_logits, ref_loss = reference_forward(params, input_ids, attention_mask, labels)
    # tolerance covers the EUP approximate reciprocal used in the in-kernel softmax
    assert jnp.allclose(logits, ref_logits, atol=2e-3, rtol=2e-3), (logits, ref_logits)
    assert jnp.allclose(loss, ref_loss, atol=2e-3, rtol=2e-3), (loss, ref_loss)

    print("KERNEL_OK")
</pallas_src>

<mosaic_0001>
module attributes {stable_mosaic.version = 11 : i64} {
  func.func @roberta_fused_kernel(%arg0: memref<24x1xi32, #tpu.memory_space<vmem>>, %arg1: memref<1x16xf32, #tpu.memory_space<vmem>>, %arg2: memref<32x16xf32, #tpu.memory_space<vmem>>, %arg3: memref<24x128xf32, #tpu.memory_space<vmem>>, %arg4: memref<144x64xf32, #tpu.memory_space<vmem>>, %arg5: memref<2x64x192xf32, #tpu.memory_space<vmem>>, %arg6: memref<2x64x64xf32, #tpu.memory_space<vmem>>, %arg7: memref<2x64x128xf32, #tpu.memory_space<vmem>>, %arg8: memref<2x128x64xf32, #tpu.memory_space<vmem>>, %arg9: memref<64x66xf32, #tpu.memory_space<vmem>>, %arg10: memref<2x2xf32, #tpu.memory_space<vmem>>, %arg11: memref<1x1xf32, #tpu.memory_space<vmem>>) attributes {dimension_semantics = [], scalar_prefetch = 0 : i64, scratch_operands = 0 : i64, tpu.core_type = #tpu.core_type<tc>} {
    %c0 = arith.constant 0 : index
    %c0_0 = arith.constant 0 : index
    %0 = vector.load %arg0[%c0, %c0_0] : memref<24x1xi32, #tpu.memory_space<vmem>>, vector<24x1xi32>
    %1 = vector.extract_strided_slice %0 {offsets = [0, 0], sizes = [16, 1], strides = [1, 1]} : vector<24x1xi32> to vector<16x1xi32>
    %2 = vector.extract_strided_slice %0 {offsets = [16, 0], sizes = [2, 1], strides = [1, 1]} : vector<24x1xi32> to vector<2x1xi32>
    %c1_i32 = arith.constant 1 : i32
    %3 = vector.broadcast %c1_i32 : i32 to vector<16x1xi32>
    %4 = arith.cmpi ne, %1, %3 : vector<16x1xi32>
    %5 = arith.extui %4 : vector<16x1xi1> to vector<16x1xi32>
    %6 = arith.sitofp %5 : vector<16x1xi32> to vector<16x1xf32>
    %c0_1 = arith.constant 0 : index
    %c0_2 = arith.constant 0 : index
    %7 = vector.load %arg2[%c0_1, %c0_2] : memref<32x16xf32, #tpu.memory_space<vmem>>, vector<16x16xf32>
    %c16 = arith.constant 16 : index
    %c0_3 = arith.constant 0 : index
    %8 = vector.load %arg2[%c16, %c0_3] : memref<32x16xf32, #tpu.memory_space<vmem>>, vector<16x16xf32>
    %cst = arith.constant dense<0.000000e+00> : vector<16x1xf32>
    %9 = tpu.matmul %7, %6, %cst {dimension_numbers = #tpu.dot_dimension_numbers<[1], [0], [0], [1], [0, 0, 1, 1], [], []>} : vector<16x16xf32>, vector<16x1xf32>, vector<16x1xf32> -> vector<16x1xf32>
    %10 = arith.fptosi %9 : vector<16x1xf32> to vector<16x1xi32>
    %11 = arith.muli %10, %5 : vector<16x1xi32>
    %c1_i32_4 = arith.constant 1 : i32
    %12 = vector.broadcast %c1_i32_4 : i32 to vector<16x1xi32>
    %13 = arith.addi %11, %12 : vector<16x1xi32>
    %14 = tpu.iota {dimensions = array<i32: 1>} : vector<16x104xi32>
    %15 = tpu.iota {dimensions = array<i32: 1>} : vector<16x32xi32>
    %16 = vector.broadcast %1 : vector<16x1xi32> to vector<16x104xi32>
    %17 = arith.cmpi eq, %14, %16 : vector<16x104xi32>
    %18 = arith.extui %17 : vector<16x104xi1> to vector<16x104xi32>
    %19 = arith.sitofp %18 : vector<16x104xi32> to vector<16x104xf32>
    %20 = vector.broadcast %13 : vector<16x1xi32> to vector<16x32xi32>
    %21 = arith.cmpi eq, %15, %20 : vector<16x32xi32>
    %22 = arith.extui %21 : vector<16x32xi1> to vector<16x32xi32>
    %23 = arith.sitofp %22 : vector<16x32xi32> to vector<16x32xf32>
    %c0_5 = arith.constant 0 : index
    %c0_6 = arith.constant 0 : index
    %24 = vector.load %arg4[%c0_5, %c0_6] : memref<144x64xf32, #tpu.memory_space<vmem>>, vector<104x64xf32>
    %cst_7 = arith.constant dense<0.000000e+00> : vector<16x64xf32>
    %25 = tpu.matmul %19, %24, %cst_7 {dimension_numbers = #tpu.dot_dimension_numbers<[1], [0], [0], [1], [0, 0, 1, 1], [], []>} : vector<16x104xf32>, vector<104x64xf32>, vector<16x64xf32> -> vector<16x64xf32>
    %c104 = arith.constant 104 : index
    %c0_8 = arith.constant 0 : index
    %26 = vector.load %arg4[%c104, %c0_8] : memref<144x64xf32, #tpu.memory_space<vmem>>, vector<32x64xf32>
    %cst_9 = arith.constant dense<0.000000e+00> : vector<16x64xf32>
    %27 = tpu.matmul %23, %26, %cst_9 {dimension_numbers = #tpu.dot_dimension_numbers<[1], [0], [0], [1], [0, 0, 1, 1], [], []>} : vector<16x32xf32>, vector<32x64xf32>, vector<16x64xf32> -> vector<16x64xf32>
    %28 = arith.addf %25, %27 : vector<16x64xf32>
    %c136 = arith.constant 136 : index
    %c0_10 = arith.constant 0 : index
    %29 = vector.load %arg4[%c136, %c0_10] : memref<144x64xf32, #tpu.memory_space<vmem>>, vector<1x64xf32>
    %30 = vector.broadcast %29 : vector<1x64xf32> to vector<16x64xf32>
    %31 = arith.addf %28, %30 : vector<16x64xf32>
    %c0_11 = arith.constant 0 : index
    %c0_12 = arith.constant 0 : index
    %32 = vector.load %arg3[%c0_11, %c0_12] : memref<24x128xf32, #tpu.memory_space<vmem>>, vector<1x64xf32>
    %c1 = arith.constant 1 : index
    %c0_13 = arith.constant 0 : index
    %33 = vector.load %arg3[%c1, %c0_13] : memref<24x128xf32, #tpu.memory_space<vmem>>, vector<1x64xf32>
    %cst_14 = arith.constant dense<0.000000e+00> : vector<16xf32>
    %34 = vector.multi_reduction <add>, %31, %cst_14 [1] : vector<16x64xf32> to vector<16xf32>
    %35 = vector.shape_cast %34 : vector<16xf32> to vector<16x1xf32>
    %cst_15 = arith.constant 6.400000e+01 : f32
    %36 = vector.broadcast %cst_15 : f32 to vector<16x1xf32>
    %37 = arith.divf %35, %36 : vector<16x1xf32>
    %38 = vector.broadcast %37 : vector<16x1xf32> to vector<16x64xf32>
    %39 = arith.subf %31, %38 : vector<16x64xf32>
    %40 = arith.mulf %39, %39 : vector<16x64xf32>
    %cst_16 = arith.constant dense<0.000000e+00> : vector<16xf32>
    %41 = vector.multi_reduction <add>, %40, %cst_16 [1] : vector<16x64xf32> to vector<16xf32>
    %42 = vector.shape_cast %41 : vector<16xf32> to vector<16x1xf32>
    %cst_17 = arith.constant 6.400000e+01 : f32
    %43 = vector.broadcast %cst_17 : f32 to vector<16x1xf32>
    %44 = arith.divf %42, %43 : vector<16x1xf32>
    %45 = vector.broadcast %37 : vector<16x1xf32> to vector<16x64xf32>
    %46 = arith.subf %31, %45 : vector<16x64xf32>
    %cst_18 = arith.constant 9.99999974E-6 : f32
    %47 = vector.broadcast %cst_18 : f32 to vector<16x1xf32>
    %48 = arith.addf %44, %47 : vector<16x1xf32>
    %49 = math.rsqrt %48 : vector<16x1xf32>
    %50 = vector.broadcast %49 : vector<16x1xf32> to vector<16x64xf32>
    %51 = arith.mulf %46, %50 : vector<16x64xf32>
    %52 = vector.broadcast %32 : vector<1x64xf32> to vector<16x64xf32>
    %53 = arith.mulf %51, %52 : vector<16x64xf32>
    %54 = vector.broadcast %33 : vector<1x64xf32> to vector<16x64xf32>
    %55 = arith.addf %53, %54 : vector<16x64xf32>
    %c0_19 = arith.constant 0 : index
    %c0_20 = arith.constant 0 : index
    %56 = vector.load %arg1[%c0_19, %c0_20] : memref<1x16xf32, #tpu.memory_space<vmem>>, vector<1x16xf32>
    %cst_21 = arith.constant 5.000000e-01 : f32
    %57 = vector.broadcast %cst_21 : f32 to vector<16x16xf32>
    %58 = arith.cmpf ogt, %8, %57 : vector<16x16xf32>
    %cst_22 = arith.constant 5.000000e-01 : f32
    %59 = vector.broadcast %cst_22 : f32 to vector<1x16xf32>
    %60 = arith.cmpf ogt, %56, %59 : vector<1x16xf32>
    %61 = vector.broadcast %60 : vector<1x16xi1> to vector<16x16xi1>
    %62 = arith.andi %58, %61 : vector<16x16xi1>
    %cst_23 = arith.constant 0.000000e+00 : f32
    %cst_24 = arith.constant -1.000000e+09 : f32
    %63 = vector.broadcast %cst_23 : f32 to vector<16x16xf32>
    %64 = vector.broadcast %cst_24 : f32 to vector<16x16xf32>
    %65 = arith.select %62, %63, %64 : vector<16x16xi1>, vector<16x16xf32>
    %c0_25 = arith.constant 0 : index
    %c0_26 = arith.constant 0 : index
    %c0_27 = arith.constant 0 : index
    %66 = vector.load %arg5[%c0_25, %c0_26, %c0_27] : memref<2x64x192xf32, #tpu.memory_space<vmem>>, vector<1x64x192xf32>
    %67 = vector.shape_cast %66 : vector<1x64x192xf32> to vector<64x192xf32>
    %cst_28 = arith.constant dense<0.000000e+00> : vector<16x192xf32>
    %68 = tpu.matmul %55, %67, %cst_28 {dimension_numbers = #tpu.dot_dimension_numbers<[1], [0], [0], [1], [0, 0, 1, 1], [], []>} : vector<16x64xf32>, vector<64x192xf32>, vector<16x192xf32> -> vector<16x192xf32>
    %69 = vector.extract_strided_slice %68 {offsets = [0, 0], sizes = [16, 64], strides = [1, 1]} : vector<16x192xf32> to vector<16x64xf32>
    %c2 = arith.constant 2 : index
    %c0_29 = arith.constant 0 : index
    %70 = vector.load %arg3[%c2, %c0_29] : memref<24x128xf32, #tpu.memory_space<vmem>>, vector<1x64xf32>
    %71 = vector.broadcast %70 : vector<1x64xf32> to vector<16x64xf32>
    %72 = arith.addf %69, %71 : vector<16x64xf32>
    %73 = vector.extract_strided_slice %68 {offsets = [0, 64], sizes = [16, 64], strides = [1, 1]} : vector<16x192xf32> to vector<16x64xf32>
    %c3 = arith.constant 3 : index
    %c0_30 = arith.constant 0 : index
    %74 = vector.load %arg3[%c3, %c0_30] : memref<24x128xf32, #tpu.memory_space<vmem>>, vector<1x64xf32>
    %75 = vector.broadcast %74 : vector<1x64xf32> to vector<16x64xf32>
    %76 = arith.addf %73, %75 : vector<16x64xf32>
    %77 = vector.extract_strided_slice %68 {offsets = [0, 128], sizes = [16, 64], strides = [1, 1]} : vector<16x192xf32> to vector<16x64xf32>
    %c4 = arith.constant 4 : index
    %c0_31 = arith.constant 0 : index
    %78 = vector.load %arg3[%c4, %c0_31] : memref<24x128xf32, #tpu.memory_space<vmem>>, vector<1x64xf32>
    %79 = vector.broadcast %78 : vector<1x64xf32> to vector<16x64xf32>
    %80 = arith.addf %77, %79 : vector<16x64xf32>
    %c0_32 = arith.constant 0 : index
    %c0_33 = arith.constant 0 : index
    %c0_34 = arith.constant 0 : index
    %81 = vector.load %arg6[%c0_32, %c0_33, %c0_34] : memref<2x64x64xf32, #tpu.memory_space<vmem>>, vector<1x64x64xf32>
    %82 = vector.shape_cast %81 : vector<1x64x64xf32> to vector<64x64xf32>
    %83 = vector.extract_strided_slice %72 {offsets = [0, 0], sizes = [16, 32], strides = [1, 1]} : vector<16x64xf32> to vector<16x32xf32>
    %84 = vector.extract_strided_slice %76 {offsets = [0, 0], sizes = [16, 32], strides = [1, 1]} : vector<16x64xf32> to vector<16x32xf32>
    %85 = vector.extract_strided_slice %80 {offsets = [0, 0], sizes = [16, 32], strides = [1, 1]} : vector<16x64xf32> to vector<16x32xf32>
    %cst_35 = arith.constant dense<0.000000e+00> : vector<16x16xf32>
    %86 = tpu.matmul %83, %84, %cst_35 {dimension_numbers = #tpu.dot_dimension_numbers<[1], [1], [0], [0], [0, 0, 1, 0], [], []>} : vector<16x32xf32>, vector<16x32xf32>, vector<16x16xf32> -> vector<16x16xf32>
    %cst_36 = arith.constant 0.176776692 : f32
    %87 = vector.broadcast %cst_36 : f32 to vector<16x16xf32>
    %88 = arith.mulf %86, %87 : vector<16x16xf32>
    %89 = arith.addf %88, %65 : vector<16x16xf32>
    %cst_37 = arith.constant dense<0xFF800000> : vector<16xf32>
    %90 = vector.multi_reduction <maximumf>, %89, %cst_37 [1] : vector<16x16xf32> to vector<16xf32>
    %91 = vector.shape_cast %90 : vector<16xf32> to vector<16x1xf32>
    %92 = vector.broadcast %91 : vector<16x1xf32> to vector<16x16xf32>
    %93 = arith.subf %89, %92 : vector<16x16xf32>
    %94 = math.exp %93 : vector<16x16xf32>
    %cst_38 = arith.constant dense<0.000000e+00> : vector<16xf32>
    %95 = vector.multi_reduction <add>, %94, %cst_38 [1] : vector<16x16xf32> to vector<16xf32>
    %96 = vector.shape_cast %95 : vector<16xf32> to vector<16x1xf32>
    %97 = tpu.reciprocal %96 {approx = true} : vector<16x1xf32> -> vector<16x1xf32>
    %98 = vector.broadcast %97 : vector<16x1xf32> to vector<16x16xf32>
    %99 = arith.mulf %94, %98 : vector<16x16xf32>
    %cst_39 = arith.constant dense<0.000000e+00> : vector<16x32xf32>
    %100 = tpu.matmul %99, %85, %cst_39 {dimension_numbers = #tpu.dot_dimension_numbers<[1], [0], [0], [1], [0, 0, 1, 1], [], []>} : vector<16x16xf32>, vector<16x32xf32>, vector<16x32xf32> -> vector<16x32xf32>
    %101 = vector.extract_strided_slice %82 {offsets = [0, 0], sizes = [32, 64], strides = [1, 1]} : vector<64x64xf32> to vector<32x64xf32>
    %cst_40 = arith.constant dense<0.000000e+00> : vector<16x64xf32>
    %102 = tpu.matmul %100, %101, %cst_40 {dimension_numbers = #tpu.dot_dimension_numbers<[1], [0], [0], [1], [0, 0, 1, 1], [], []>} : vector<16x32xf32>, vector<32x64xf32>, vector<16x64xf32> -> vector<16x64xf32>
    %103 = vector.extract_strided_slice %72 {offsets = [0, 32], sizes = [16, 32], strides = [1, 1]} : vector<16x64xf32> to vector<16x32xf32>
    %104 = vector.extract_strided_slice %76 {offsets = [0, 32], sizes = [16, 32], strides = [1, 1]} : vector<16x64xf32> to vector<16x32xf32>
    %105 = vector.extract_strided_slice %80 {offsets = [0, 32], sizes = [16, 32], strides = [1, 1]} : vector<16x64xf32> to vector<16x32xf32>
    %cst_41 = arith.constant dense<0.000000e+00> : vector<16x16xf32>
    %106 = tpu.matmul %103, %104, %cst_41 {dimension_numbers = #tpu.dot_dimension_numbers<[1], [1], [0], [0], [0, 0, 1, 0], [], []>} : vector<16x32xf32>, vector<16x32xf32>, vector<16x16xf32> -> vector<16x16xf32>
    %cst_42 = arith.constant 0.176776692 : f32
    %107 = vector.broadcast %cst_42 : f32 to vector<16x16xf32>
    %108 = arith.mulf %106, %107 : vector<16x16xf32>
    %109 = arith.addf %108, %65 : vector<16x16xf32>
    %cst_43 = arith.constant dense<0xFF800000> : vector<16xf32>
    %110 = vector.multi_reduction <maximumf>, %109, %cst_43 [1] : vector<16x16xf32> to vector<16xf32>
    %111 = vector.shape_cast %110 : vector<16xf32> to vector<16x1xf32>
    %112 = vector.broadcast %111 : vector<16x1xf32> to vector<16x16xf32>
    %113 = arith.subf %109, %112 : vector<16x16xf32>
    %114 = math.exp %113 : vector<16x16xf32>
    %cst_44 = arith.constant dense<0.000000e+00> : vector<16xf32>
    %115 = vector.multi_reduction <add>, %114, %cst_44 [1] : vector<16x16xf32> to vector<16xf32>
    %116 = vector.shape_cast %115 : vector<16xf32> to vector<16x1xf32>
    %117 = tpu.reciprocal %116 {approx = true} : vector<16x1xf32> -> vector<16x1xf32>
    %118 = vector.broadcast %117 : vector<16x1xf32> to vector<16x16xf32>
    %119 = arith.mulf %114, %118 : vector<16x16xf32>
    %cst_45 = arith.constant dense<0.000000e+00> : vector<16x32xf32>
    %120 = tpu.matmul %119, %105, %cst_45 {dimension_numbers = #tpu.dot_dimension_numbers<[1], [0], [0], [1], [0, 0, 1, 1], [], []>} : vector<16x16xf32>, vector<16x32xf32>, vector<16x32xf32> -> vector<16x32xf32>
    %121 = vector.extract_strided_slice %82 {offsets = [32, 0], sizes = [32, 64], strides = [1, 1]} : vector<64x64xf32> to vector<32x64xf32>
    %cst_46 = arith.constant dense<0.000000e+00> : vector<16x64xf32>
    %122 = tpu.matmul %120, %121, %cst_46 {dimension_numbers = #tpu.dot_dimension_numbers<[1], [0], [0], [1], [0, 0, 1, 1], [], []>} : vector<16x32xf32>, vector<32x64xf32>, vector<16x64xf32> -> vector<16x64xf32>
    %123 = arith.addf %102, %122 : vector<16x64xf32>
    %c5 = arith.constant 5 : index
    %c0_47 = arith.constant 0 : index
    %124 = vector.load %arg3[%c5, %c0_47] : memref<24x128xf32, #tpu.memory_space<vmem>>, vector<1x64xf32>
    %125 = vector.broadcast %124 : vector<1x64xf32> to vector<16x64xf32>
    %126 = arith.addf %123, %125 : vector<16x64xf32>
    %127 = arith.addf %126, %55 : vector<16x64xf32>
    %c6 = arith.constant 6 : index
    %c0_48 = arith.constant 0 : index
    %128 = vector.load %arg3[%c6, %c0_48] : memref<24x128xf32, #tpu.memory_space<vmem>>, vector<1x64xf32>
    %c7 = arith.constant 7 : index
    %c0_49 = arith.constant 0 : index
    %129 = vector.load %arg3[%c7, %c0_49] : memref<24x128xf32, #tpu.memory_space<vmem>>, vector<1x64xf32>
    %cst_50 = arith.constant dense<0.000000e+00> : vector<16xf32>
    %130 = vector.multi_reduction <add>, %127, %cst_50 [1] : vector<16x64xf32> to vector<16xf32>
    %131 = vector.shape_cast %130 : vector<16xf32> to vector<16x1xf32>
    %cst_51 = arith.constant 6.400000e+01 : f32
    %132 = vector.broadcast %cst_51 : f32 to vector<16x1xf32>
    %133 = arith.divf %131, %132 : vector<16x1xf32>
    %134 = vector.broadcast %133 : vector<16x1xf32> to vector<16x64xf32>
    %135 = arith.subf %127, %134 : vector<16x64xf32>
    %136 = arith.mulf %135, %135 : vector<16x64xf32>
    %cst_52 = arith.constant dense<0.000000e+00> : vector<16xf32>
    %137 = vector.multi_reduction <add>, %136, %cst_52 [1] : vector<16x64xf32> to vector<16xf32>
    %138 = vector.shape_cast %137 : vector<16xf32> to vector<16x1xf32>
    %cst_53 = arith.constant 6.400000e+01 : f32
    %139 = vector.broadcast %cst_53 : f32 to vector<16x1xf32>
    %140 = arith.divf %138, %139 : vector<16x1xf32>
    %141 = vector.broadcast %133 : vector<16x1xf32> to vector<16x64xf32>
    %142 = arith.subf %127, %141 : vector<16x64xf32>
    %cst_54 = arith.constant 9.99999974E-6 : f32
    %143 = vector.broadcast %cst_54 : f32 to vector<16x1xf32>
    %144 = arith.addf %140, %143 : vector<16x1xf32>
    %145 = math.rsqrt %144 : vector<16x1xf32>
    %146 = vector.broadcast %145 : vector<16x1xf32> to vector<16x64xf32>
    %147 = arith.mulf %142, %146 : vector<16x64xf32>
    %148 = vector.broadcast %128 : vector<1x64xf32> to vector<16x64xf32>
    %149 = arith.mulf %147, %148 : vector<16x64xf32>
    %150 = vector.broadcast %129 : vector<1x64xf32> to vector<16x64xf32>
    %151 = arith.addf %149, %150 : vector<16x64xf32>
    %c0_55 = arith.constant 0 : index
    %c0_56 = arith.constant 0 : index
    %c0_57 = arith.constant 0 : index
    %152 = vector.load %arg7[%c0_55, %c0_56, %c0_57] : memref<2x64x128xf32, #tpu.memory_space<vmem>>, vector<1x64x128xf32>
    %153 = vector.shape_cast %152 : vector<1x64x128xf32> to vector<64x128xf32>
    %cst_58 = arith.constant dense<0.000000e+00> : vector<16x128xf32>
    %154 = tpu.matmul %151, %153, %cst_58 {dimension_numbers = #tpu.dot_dimension_numbers<[1], [0], [0], [1], [0, 0, 1, 1], [], []>} : vector<16x64xf32>, vector<64x128xf32>, vector<16x128xf32> -> vector<16x128xf32>
    %c8 = arith.constant 8 : index
    %c0_59 = arith.constant 0 : index
    %155 = vector.load %arg3[%c8, %c0_59] : memref<24x128xf32, #tpu.memory_space<vmem>>, vector<1x128xf32>
    %156 = vector.broadcast %155 : vector<1x128xf32> to vector<16x128xf32>
    %157 = arith.addf %154, %156 : vector<16x128xf32>
    %158 = arith.mulf %157, %157 : vector<16x128xf32>
    %159 = arith.mulf %157, %158 : vector<16x128xf32>
    %cst_60 = arith.constant 4.471500e-02 : f32
    %160 = vector.broadcast %cst_60 : f32 to vector<16x128xf32>
    %161 = arith.mulf %160, %159 : vector<16x128xf32>
    %162 = arith.addf %157, %161 : vector<16x128xf32>
    %cst_61 = arith.constant 0.797884583 : f32
    %163 = vector.broadcast %cst_61 : f32 to vector<16x128xf32>
    %164 = arith.mulf %163, %162 : vector<16x128xf32>
    %165 = math.tanh %164 : vector<16x128xf32>
    %cst_62 = arith.constant 1.000000e+00 : f32
    %166 = vector.broadcast %cst_62 : f32 to vector<16x128xf32>
    %167 = arith.addf %166, %165 : vector<16x128xf32>
    %cst_63 = arith.constant 5.000000e-01 : f32
    %168 = vector.broadcast %cst_63 : f32 to vector<16x128xf32>
    %169 = arith.mulf %168, %167 : vector<16x128xf32>
    %170 = arith.mulf %157, %169 : vector<16x128xf32>
    %c0_64 = arith.constant 0 : index
    %c0_65 = arith.constant 0 : index
    %c0_66 = arith.constant 0 : index
    %171 = vector.load %arg8[%c0_64, %c0_65, %c0_66] : memref<2x128x64xf32, #tpu.memory_space<vmem>>, vector<1x128x64xf32>
    %172 = vector.shape_cast %171 : vector<1x128x64xf32> to vector<128x64xf32>
    %cst_67 = arith.constant dense<0.000000e+00> : vector<16x64xf32>
    %173 = tpu.matmul %170, %172, %cst_67 {dimension_numbers = #tpu.dot_dimension_numbers<[1], [0], [0], [1], [0, 0, 1, 1], [], []>} : vector<16x128xf32>, vector<128x64xf32>, vector<16x64xf32> -> vector<16x64xf32>
    %c9 = arith.constant 9 : index
    %c0_68 = arith.constant 0 : index
    %174 = vector.load %arg3[%c9, %c0_68] : memref<24x128xf32, #tpu.memory_space<vmem>>, vector<1x64xf32>
    %175 = vector.broadcast %174 : vector<1x64xf32> to vector<16x64xf32>
    %176 = arith.addf %173, %175 : vector<16x64xf32>
    %177 = arith.addf %176, %151 : vector<16x64xf32>
    %c10 = arith.constant 10 : index
    %c0_69 = arith.constant 0 : index
    %178 = vector.load %arg3[%c10, %c0_69] : memref<24x128xf32, #tpu.memory_space<vmem>>, vector<1x64xf32>
    %c11 = arith.constant 11 : index
    %c0_70 = arith.constant 0 : index
    %179 = vector.load %arg3[%c11, %c0_70] : memref<24x128xf32, #tpu.memory_space<vmem>>, vector<1x64xf32>
    %cst_71 = arith.constant dense<0.000000e+00> : vector<16xf32>
    %180 = vector.multi_reduction <add>, %177, %cst_71 [1] : vector<16x64xf32> to vector<16xf32>
    %181 = vector.shape_cast %180 : vector<16xf32> to vector<16x1xf32>
    %cst_72 = arith.constant 6.400000e+01 : f32
    %182 = vector.broadcast %cst_72 : f32 to vector<16x1xf32>
    %183 = arith.divf %181, %182 : vector<16x1xf32>
    %184 = vector.broadcast %183 : vector<16x1xf32> to vector<16x64xf32>
    %185 = arith.subf %177, %184 : vector<16x64xf32>
    %186 = arith.mulf %185, %185 : vector<16x64xf32>
    %cst_73 = arith.constant dense<0.000000e+00> : vector<16xf32>
    %187 = vector.multi_reduction <add>, %186, %cst_73 [1] : vector<16x64xf32> to vector<16xf32>
    %188 = vector.shape_cast %187 : vector<16xf32> to vector<16x1xf32>
    %cst_74 = arith.constant 6.400000e+01 : f32
    %189 = vector.broadcast %cst_74 : f32 to vector<16x1xf32>
    %190 = arith.divf %188, %189 : vector<16x1xf32>
    %191 = vector.broadcast %183 : vector<16x1xf32> to vector<16x64xf32>
    %192 = arith.subf %177, %191 : vector<16x64xf32>
    %cst_75 = arith.constant 9.99999974E-6 : f32
    %193 = vector.broadcast %cst_75 : f32 to vector<16x1xf32>
    %194 = arith.addf %190, %193 : vector<16x1xf32>
    %195 = math.rsqrt %194 : vector<16x1xf32>
    %196 = vector.broadcast %195 : vector<16x1xf32> to vector<16x64xf32>
    %197 = arith.mulf %192, %196 : vector<16x64xf32>
    %198 = vector.broadcast %178 : vector<1x64xf32> to vector<16x64xf32>
    %199 = arith.mulf %197, %198 : vector<16x64xf32>
    %200 = vector.broadcast %179 : vector<1x64xf32> to vector<16x64xf32>
    %201 = arith.addf %199, %200 : vector<16x64xf32>
    %c1_76 = arith.constant 1 : index
    %c0_77 = arith.constant 0 : index
    %c0_78 = arith.constant 0 : index
    %202 = vector.load %arg5[%c1_76, %c0_77, %c0_78] : memref<2x64x192xf32, #tpu.memory_space<vmem>>, vector<1x64x192xf32>
    %203 = vector.shape_cast %202 : vector<1x64x192xf32> to vector<64x192xf32>
    %cst_79 = arith.constant dense<0.000000e+00> : vector<16x192xf32>
    %204 = tpu.matmul %201, %203, %cst_79 {dimension_numbers = #tpu.dot_dimension_numbers<[1], [0], [0], [1], [0, 0, 1, 1], [], []>} : vector<16x64xf32>, vector<64x192xf32>, vector<16x192xf32> -> vector<16x192xf32>
    %205 = vector.extract_strided_slice %204 {offsets = [0, 0], sizes = [16, 64], strides = [1, 1]} : vector<16x192xf32> to vector<16x64xf32>
    %c12 = arith.constant 12 : index
    %c0_80 = arith.constant 0 : index
    %206 = vector.load %arg3[%c12, %c0_80] : memref<24x128xf32, #tpu.memory_space<vmem>>, vector<1x64xf32>
    %207 = vector.broadcast %206 : vector<1x64xf32> to vector<16x64xf32>
    %208 = arith.addf %205, %207 : vector<16x64xf32>
    %209 = vector.extract_strided_slice %204 {offsets = [0, 64], sizes = [16, 64], strides = [1, 1]} : vector<16x192xf32> to vector<16x64xf32>
    %c13 = arith.constant 13 : index
    %c0_81 = arith.constant 0 : index
    %210 = vector.load %arg3[%c13, %c0_81] : memref<24x128xf32, #tpu.memory_space<vmem>>, vector<1x64xf32>
    %211 = vector.broadcast %210 : vector<1x64xf32> to vector<16x64xf32>
    %212 = arith.addf %209, %211 : vector<16x64xf32>
    %213 = vector.extract_strided_slice %204 {offsets = [0, 128], sizes = [16, 64], strides = [1, 1]} : vector<16x192xf32> to vector<16x64xf32>
    %c14 = arith.constant 14 : index
    %c0_82 = arith.constant 0 : index
    %214 = vector.load %arg3[%c14, %c0_82] : memref<24x128xf32, #tpu.memory_space<vmem>>, vector<1x64xf32>
    %215 = vector.broadcast %214 : vector<1x64xf32> to vector<16x64xf32>
    %216 = arith.addf %213, %215 : vector<16x64xf32>
    %c1_83 = arith.constant 1 : index
    %c0_84 = arith.constant 0 : index
    %c0_85 = arith.constant 0 : index
    %217 = vector.load %arg6[%c1_83, %c0_84, %c0_85] : memref<2x64x64xf32, #tpu.memory_space<vmem>>, vector<1x64x64xf32>
    %218 = vector.shape_cast %217 : vector<1x64x64xf32> to vector<64x64xf32>
    %219 = vector.extract_strided_slice %208 {offsets = [0, 0], sizes = [16, 32], strides = [1, 1]} : vector<16x64xf32> to vector<16x32xf32>
    %220 = vector.extract_strided_slice %212 {offsets = [0, 0], sizes = [16, 32], strides = [1, 1]} : vector<16x64xf32> to vector<16x32xf32>
    %221 = vector.extract_strided_slice %216 {offsets = [0, 0], sizes = [16, 32], strides = [1, 1]} : vector<16x64xf32> to vector<16x32xf32>
    %cst_86 = arith.constant dense<0.000000e+00> : vector<16x16xf32>
    %222 = tpu.matmul %219, %220, %cst_86 {dimension_numbers = #tpu.dot_dimension_numbers<[1], [1], [0], [0], [0, 0, 1, 0], [], []>} : vector<16x32xf32>, vector<16x32xf32>, vector<16x16xf32> -> vector<16x16xf32>
    %cst_87 = arith.constant 0.176776692 : f32
    %223 = vector.broadcast %cst_87 : f32 to vector<16x16xf32>
    %224 = arith.mulf %222, %223 : vector<16x16xf32>
    %225 = arith.addf %224, %65 : vector<16x16xf32>
    %cst_88 = arith.constant dense<0xFF800000> : vector<16xf32>
    %226 = vector.multi_reduction <maximumf>, %225, %cst_88 [1] : vector<16x16xf32> to vector<16xf32>
    %227 = vector.shape_cast %226 : vector<16xf32> to vector<16x1xf32>
    %228 = vector.broadcast %227 : vector<16x1xf32> to vector<16x16xf32>
    %229 = arith.subf %225, %228 : vector<16x16xf32>
    %230 = math.exp %229 : vector<16x16xf32>
    %cst_89 = arith.constant dense<0.000000e+00> : vector<16xf32>
    %231 = vector.multi_reduction <add>, %230, %cst_89 [1] : vector<16x16xf32> to vector<16xf32>
    %232 = vector.shape_cast %231 : vector<16xf32> to vector<16x1xf32>
    %233 = tpu.reciprocal %232 {approx = true} : vector<16x1xf32> -> vector<16x1xf32>
    %234 = vector.broadcast %233 : vector<16x1xf32> to vector<16x16xf32>
    %235 = arith.mulf %230, %234 : vector<16x16xf32>
    %cst_90 = arith.constant dense<0.000000e+00> : vector<16x32xf32>
    %236 = tpu.matmul %235, %221, %cst_90 {dimension_numbers = #tpu.dot_dimension_numbers<[1], [0], [0], [1], [0, 0, 1, 1], [], []>} : vector<16x16xf32>, vector<16x32xf32>, vector<16x32xf32> -> vector<16x32xf32>
    %237 = vector.extract_strided_slice %218 {offsets = [0, 0], sizes = [32, 64], strides = [1, 1]} : vector<64x64xf32> to vector<32x64xf32>
    %cst_91 = arith.constant dense<0.000000e+00> : vector<16x64xf32>
    %238 = tpu.matmul %236, %237, %cst_91 {dimension_numbers = #tpu.dot_dimension_numbers<[1], [0], [0], [1], [0, 0, 1, 1], [], []>} : vector<16x32xf32>, vector<32x64xf32>, vector<16x64xf32> -> vector<16x64xf32>
    %239 = vector.extract_strided_slice %208 {offsets = [0, 32], sizes = [16, 32], strides = [1, 1]} : vector<16x64xf32> to vector<16x32xf32>
    %240 = vector.extract_strided_slice %212 {offsets = [0, 32], sizes = [16, 32], strides = [1, 1]} : vector<16x64xf32> to vector<16x32xf32>
    %241 = vector.extract_strided_slice %216 {offsets = [0, 32], sizes = [16, 32], strides = [1, 1]} : vector<16x64xf32> to vector<16x32xf32>
    %cst_92 = arith.constant dense<0.000000e+00> : vector<16x16xf32>
    %242 = tpu.matmul %239, %240, %cst_92 {dimension_numbers = #tpu.dot_dimension_numbers<[1], [1], [0], [0], [0, 0, 1, 0], [], []>} : vector<16x32xf32>, vector<16x32xf32>, vector<16x16xf32> -> vector<16x16xf32>
    %cst_93 = arith.constant 0.176776692 : f32
    %243 = vector.broadcast %cst_93 : f32 to vector<16x16xf32>
    %244 = arith.mulf %242, %243 : vector<16x16xf32>
    %245 = arith.addf %244, %65 : vector<16x16xf32>
    %cst_94 = arith.constant dense<0xFF800000> : vector<16xf32>
    %246 = vector.multi_reduction <maximumf>, %245, %cst_94 [1] : vector<16x16xf32> to vector<16xf32>
    %247 = vector.shape_cast %246 : vector<16xf32> to vector<16x1xf32>
    %248 = vector.broadcast %247 : vector<16x1xf32> to vector<16x16xf32>
    %249 = arith.subf %245, %248 : vector<16x16xf32>
    %250 = math.exp %249 : vector<16x16xf32>
    %cst_95 = arith.constant dense<0.000000e+00> : vector<16xf32>
    %251 = vector.multi_reduction <add>, %250, %cst_95 [1] : vector<16x16xf32> to vector<16xf32>
    %252 = vector.shape_cast %251 : vector<16xf32> to vector<16x1xf32>
    %253 = tpu.reciprocal %252 {approx = true} : vector<16x1xf32> -> vector<16x1xf32>
    %254 = vector.broadcast %253 : vector<16x1xf32> to vector<16x16xf32>
    %255 = arith.mulf %250, %254 : vector<16x16xf32>
    %cst_96 = arith.constant dense<0.000000e+00> : vector<16x32xf32>
    %256 = tpu.matmul %255, %241, %cst_96 {dimension_numbers = #tpu.dot_dimension_numbers<[1], [0], [0], [1], [0, 0, 1, 1], [], []>} : vector<16x16xf32>, vector<16x32xf32>, vector<16x32xf32> -> vector<16x32xf32>
    %257 = vector.extract_strided_slice %218 {offsets = [32, 0], sizes = [32, 64], strides = [1, 1]} : vector<64x64xf32> to vector<32x64xf32>
    %cst_97 = arith.constant dense<0.000000e+00> : vector<16x64xf32>
    %258 = tpu.matmul %256, %257, %cst_97 {dimension_numbers = #tpu.dot_dimension_numbers<[1], [0], [0], [1], [0, 0, 1, 1], [], []>} : vector<16x32xf32>, vector<32x64xf32>, vector<16x64xf32> -> vector<16x64xf32>
    %259 = arith.addf %238, %258 : vector<16x64xf32>
    %c15 = arith.constant 15 : index
    %c0_98 = arith.constant 0 : index
    %260 = vector.load %arg3[%c15, %c0_98] : memref<24x128xf32, #tpu.memory_space<vmem>>, vector<1x64xf32>
    %261 = vector.broadcast %260 : vector<1x64xf32> to vector<16x64xf32>
    %262 = arith.addf %259, %261 : vector<16x64xf32>
    %263 = arith.addf %262, %201 : vector<16x64xf32>
    %c16_99 = arith.constant 16 : index
    %c0_100 = arith.constant 0 : index
    %264 = vector.load %arg3[%c16_99, %c0_100] : memref<24x128xf32, #tpu.memory_space<vmem>>, vector<1x64xf32>
    %c17 = arith.constant 17 : index
    %c0_101 = arith.constant 0 : index
    %265 = vector.load %arg3[%c17, %c0_101] : memref<24x128xf32, #tpu.memory_space<vmem>>, vector<1x64xf32>
    %cst_102 = arith.constant dense<0.000000e+00> : vector<16xf32>
    %266 = vector.multi_reduction <add>, %263, %cst_102 [1] : vector<16x64xf32> to vector<16xf32>
    %267 = vector.shape_cast %266 : vector<16xf32> to vector<16x1xf32>
    %cst_103 = arith.constant 6.400000e+01 : f32
    %268 = vector.broadcast %cst_103 : f32 to vector<16x1xf32>
    %269 = arith.divf %267, %268 : vector<16x1xf32>
    %270 = vector.broadcast %269 : vector<16x1xf32> to vector<16x64xf32>
    %271 = arith.subf %263, %270 : vector<16x64xf32>
    %272 = arith.mulf %271, %271 : vector<16x64xf32>
    %cst_104 = arith.constant dense<0.000000e+00> : vector<16xf32>
    %273 = vector.multi_reduction <add>, %272, %cst_104 [1] : vector<16x64xf32> to vector<16xf32>
    %274 = vector.shape_cast %273 : vector<16xf32> to vector<16x1xf32>
    %cst_105 = arith.constant 6.400000e+01 : f32
    %275 = vector.broadcast %cst_105 : f32 to vector<16x1xf32>
    %276 = arith.divf %274, %275 : vector<16x1xf32>
    %277 = vector.broadcast %269 : vector<16x1xf32> to vector<16x64xf32>
    %278 = arith.subf %263, %277 : vector<16x64xf32>
    %cst_106 = arith.constant 9.99999974E-6 : f32
    %279 = vector.broadcast %cst_106 : f32 to vector<16x1xf32>
    %280 = arith.addf %276, %279 : vector<16x1xf32>
    %281 = math.rsqrt %280 : vector<16x1xf32>
    %282 = vector.broadcast %281 : vector<16x1xf32> to vector<16x64xf32>
    %283 = arith.mulf %278, %282 : vector<16x64xf32>
    %284 = vector.broadcast %264 : vector<1x64xf32> to vector<16x64xf32>
    %285 = arith.mulf %283, %284 : vector<16x64xf32>
    %286 = vector.broadcast %265 : vector<1x64xf32> to vector<16x64xf32>
    %287 = arith.addf %285, %286 : vector<16x64xf32>
    %c1_107 = arith.constant 1 : index
    %c0_108 = arith.constant 0 : index
    %c0_109 = arith.constant 0 : index
    %288 = vector.load %arg7[%c1_107, %c0_108, %c0_109] : memref<2x64x128xf32, #tpu.memory_space<vmem>>, vector<1x64x128xf32>
    %289 = vector.shape_cast %288 : vector<1x64x128xf32> to vector<64x128xf32>
    %cst_110 = arith.constant dense<0.000000e+00> : vector<16x128xf32>
    %290 = tpu.matmul %287, %289, %cst_110 {dimension_numbers = #tpu.dot_dimension_numbers<[1], [0], [0], [1], [0, 0, 1, 1], [], []>} : vector<16x64xf32>, vector<64x128xf32>, vector<16x128xf32> -> vector<16x128xf32>
    %c18 = arith.constant 18 : index
    %c0_111 = arith.constant 0 : index
    %291 = vector.load %arg3[%c18, %c0_111] : memref<24x128xf32, #tpu.memory_space<vmem>>, vector<1x128xf32>
    %292 = vector.broadcast %291 : vector<1x128xf32> to vector<16x128xf32>
    %293 = arith.addf %290, %292 : vector<16x128xf32>
    %294 = arith.mulf %293, %293 : vector<16x128xf32>
    %295 = arith.mulf %293, %294 : vector<16x128xf32>
    %cst_112 = arith.constant 4.471500e-02 : f32
    %296 = vector.broadcast %cst_112 : f32 to vector<16x128xf32>
    %297 = arith.mulf %296, %295 : vector<16x128xf32>
    %298 = arith.addf %293, %297 : vector<16x128xf32>
    %cst_113 = arith.constant 0.797884583 : f32
    %299 = vector.broadcast %cst_113 : f32 to vector<16x128xf32>
    %300 = arith.mulf %299, %298 : vector<16x128xf32>
    %301 = math.tanh %300 : vector<16x128xf32>
    %cst_114 = arith.constant 1.000000e+00 : f32
    %302 = vector.broadcast %cst_114 : f32 to vector<16x128xf32>
    %303 = arith.addf %302, %301 : vector<16x128xf32>
    %cst_115 = arith.constant 5.000000e-01 : f32
    %304 = vector.broadcast %cst_115 : f32 to vector<16x128xf32>
    %305 = arith.mulf %304, %303 : vector<16x128xf32>
    %306 = arith.mulf %293, %305 : vector<16x128xf32>
    %c1_116 = arith.constant 1 : index
    %c0_117 = arith.constant 0 : index
    %c0_118 = arith.constant 0 : index
    %307 = vector.load %arg8[%c1_116, %c0_117, %c0_118] : memref<2x128x64xf32, #tpu.memory_space<vmem>>, vector<1x128x64xf32>
    %308 = vector.shape_cast %307 : vector<1x128x64xf32> to vector<128x64xf32>
    %cst_119 = arith.constant dense<0.000000e+00> : vector<16x64xf32>
    %309 = tpu.matmul %306, %308, %cst_119 {dimension_numbers = #tpu.dot_dimension_numbers<[1], [0], [0], [1], [0, 0, 1, 1], [], []>} : vector<16x128xf32>, vector<128x64xf32>, vector<16x64xf32> -> vector<16x64xf32>
    %c19 = arith.constant 19 : index
    %c0_120 = arith.constant 0 : index
    %310 = vector.load %arg3[%c19, %c0_120] : memref<24x128xf32, #tpu.memory_space<vmem>>, vector<1x64xf32>
    %311 = vector.broadcast %310 : vector<1x64xf32> to vector<16x64xf32>
    %312 = arith.addf %309, %311 : vector<16x64xf32>
    %313 = arith.addf %312, %287 : vector<16x64xf32>
    %c20 = arith.constant 20 : index
    %c0_121 = arith.constant 0 : index
    %314 = vector.load %arg3[%c20, %c0_121] : memref<24x128xf32, #tpu.memory_space<vmem>>, vector<1x64xf32>
    %c21 = arith.constant 21 : index
    %c0_122 = arith.constant 0 : index
    %315 = vector.load %arg3[%c21, %c0_122] : memref<24x128xf32, #tpu.memory_space<vmem>>, vector<1x64xf32>
    %cst_123 = arith.constant dense<0.000000e+00> : vector<16xf32>
    %316 = vector.multi_reduction <add>, %313, %cst_123 [1] : vector<16x64xf32> to vector<16xf32>
    %317 = vector.shape_cast %316 : vector<16xf32> to vector<16x1xf32>
    %cst_124 = arith.constant 6.400000e+01 : f32
    %318 = vector.broadcast %cst_124 : f32 to vector<16x1xf32>
    %319 = arith.divf %317, %318 : vector<16x1xf32>
    %320 = vector.broadcast %319 : vector<16x1xf32> to vector<16x64xf32>
    %321 = arith.subf %313, %320 : vector<16x64xf32>
    %322 = arith.mulf %321, %321 : vector<16x64xf32>
    %cst_125 = arith.constant dense<0.000000e+00> : vector<16xf32>
    %323 = vector.multi_reduction <add>, %322, %cst_125 [1] : vector<16x64xf32> to vector<16xf32>
    %324 = vector.shape_cast %323 : vector<16xf32> to vector<16x1xf32>
    %cst_126 = arith.constant 6.400000e+01 : f32
    %325 = vector.broadcast %cst_126 : f32 to vector<16x1xf32>
    %326 = arith.divf %324, %325 : vector<16x1xf32>
    %327 = vector.broadcast %319 : vector<16x1xf32> to vector<16x64xf32>
    %328 = arith.subf %313, %327 : vector<16x64xf32>
    %cst_127 = arith.constant 9.99999974E-6 : f32
    %329 = vector.broadcast %cst_127 : f32 to vector<16x1xf32>
    %330 = arith.addf %326, %329 : vector<16x1xf32>
    %331 = math.rsqrt %330 : vector<16x1xf32>
    %332 = vector.broadcast %331 : vector<16x1xf32> to vector<16x64xf32>
    %333 = arith.mulf %328, %332 : vector<16x64xf32>
    %334 = vector.broadcast %314 : vector<1x64xf32> to vector<16x64xf32>
    %335 = arith.mulf %333, %334 : vector<16x64xf32>
    %336 = vector.broadcast %315 : vector<1x64xf32> to vector<16x64xf32>
    %337 = arith.addf %335, %336 : vector<16x64xf32>
    %338 = vector.extract_strided_slice %337 {offsets = [0, 0], sizes = [1, 64], strides = [1, 1]} : vector<16x64xf32> to vector<1x64xf32>
    %339 = vector.extract_strided_slice %337 {offsets = [8, 0], sizes = [1, 64], strides = [1, 1]} : vector<16x64xf32> to vector<1x64xf32>
    %340 = tpu.concatenate %338, %339 in 0 : vector<1x64xf32>, vector<1x64xf32> -> vector<2x64xf32>
    %c0_128 = arith.constant 0 : index
    %c0_129 = arith.constant 0 : index
    %341 = vector.load %arg9[%c0_128, %c0_129] : memref<64x66xf32, #tpu.memory_space<vmem>>, vector<64x66xf32>
    %342 = vector.extract_strided_slice %341 {offsets = [0, 0], sizes = [64, 64], strides = [1, 1]} : vector<64x66xf32> to vector<64x64xf32>
    %cst_130 = arith.constant dense<0.000000e+00> : vector<2x64xf32>
    %343 = tpu.matmul %340, %342, %cst_130 {dimension_numbers = #tpu.dot_dimension_numbers<[1], [0], [0], [1], [0, 0, 1, 1], [], []>} : vector<2x64xf32>, vector<64x64xf32>, vector<2x64xf32> -> vector<2x64xf32>
    %c22 = arith.constant 22 : index
    %c0_131 = arith.constant 0 : index
    %344 = vector.load %arg3[%c22, %c0_131] : memref<24x128xf32, #tpu.memory_space<vmem>>, vector<1x64xf32>
    %345 = vector.broadcast %344 : vector<1x64xf32> to vector<2x64xf32>
    %346 = arith.addf %343, %345 : vector<2x64xf32>
    %347 = math.tanh %346 : vector<2x64xf32>
    %348 = vector.extract_strided_slice %341 {offsets = [0, 64], sizes = [64, 2], strides = [1, 1]} : vector<64x66xf32> to vector<64x2xf32>
    %cst_132 = arith.constant dense<0.000000e+00> : vector<2x2xf32>
    %349 = tpu.matmul %347, %348, %cst_132 {dimension_numbers = #tpu.dot_dimension_numbers<[1], [0], [0], [1], [0, 0, 1, 1], [], []>} : vector<2x64xf32>, vector<64x2xf32>, vector<2x2xf32> -> vector<2x2xf32>
    %c23 = arith.constant 23 : index
    %c0_133 = arith.constant 0 : index
    %350 = vector.load %arg3[%c23, %c0_133] : memref<24x128xf32, #tpu.memory_space<vmem>>, vector<1x2xf32>
    %351 = vector.broadcast %350 : vector<1x2xf32> to vector<2x2xf32>
    %352 = arith.addf %349, %351 : vector<2x2xf32>
    %353 = tpu.iota {dimensions = array<i32: 1>} : vector<2x2xi32>
    %354 = vector.broadcast %2 : vector<2x1xi32> to vector<2x2xi32>
    %355 = arith.cmpi eq, %353, %354 : vector<2x2xi32>
    %356 = arith.extui %355 : vector<2x2xi1> to vector<2x2xi32>
    %357 = arith.sitofp %356 : vector<2x2xi32> to vector<2x2xf32>
    %cst_134 = arith.constant dense<0xFF800000> : vector<2xf32>
    %358 = vector.multi_reduction <maximumf>, %352, %cst_134 [1] : vector<2x2xf32> to vector<2xf32>
    %359 = vector.shape_cast %358 : vector<2xf32> to vector<2x1xf32>
    %360 = vector.broadcast %359 : vector<2x1xf32> to vector<2x2xf32>
    %361 = arith.subf %352, %360 : vector<2x2xf32>
    %362 = math.exp %361 : vector<2x2xf32>
    %cst_135 = arith.constant dense<0.000000e+00> : vector<2xf32>
    %363 = vector.multi_reduction <add>, %362, %cst_135 [1] : vector<2x2xf32> to vector<2xf32>
    %364 = vector.shape_cast %363 : vector<2xf32> to vector<2x1xf32>
    %365 = math.log %364 : vector<2x1xf32>
    %366 = arith.addf %359, %365 : vector<2x1xf32>
    %367 = vector.broadcast %366 : vector<2x1xf32> to vector<2x2xf32>
    %368 = arith.subf %352, %367 : vector<2x2xf32>
    %369 = arith.mulf %357, %368 : vector<2x2xf32>
    %370 = vector.shape_cast %369 : vector<2x2xf32> to vector<1x2x2xf32>
    %cst_136 = arith.constant dense<0.000000e+00> : vector<1xf32>
    %371 = vector.multi_reduction <add>, %370, %cst_136 [1, 2] : vector<1x2x2xf32> to vector<1xf32>
    %372 = vector.shape_cast %371 : vector<1xf32> to vector<1x1x1xf32>
    %373 = vector.extract %372[0, 0, 0] : f32 from vector<1x1x1xf32>
    %cst_137 = arith.constant 0.000000e+00 : f32
    %374 = arith.subf %cst_137, %373 : f32
    %cst_138 = arith.constant 2.000000e+00 : f32
    %375 = arith.divf %374, %cst_138 : f32
    %c0_139 = arith.constant 0 : index
    %c0_140 = arith.constant 0 : index
    %376 = vector.load %arg10[%c0_139, %c0_140] : memref<2x2xf32, #tpu.memory_space<vmem>>, vector<2x2xf32>
    tpu.vector_store %arg10[%c0_139, %c0_140], %352 {strides = array<i32>} : memref<2x2xf32, #tpu.memory_space<vmem>>, vector<2x2xf32>,
    %377 = vector.broadcast %375 : f32 to vector<1x1xf32>
    %c0_141 = arith.constant 0 : index
    %c0_142 = arith.constant 0 : index
    %378 = vector.load %arg11[%c0_141, %c0_142] : memref<1x1xf32, #tpu.memory_space<vmem>>, vector<1x1xf32>
    tpu.vector_store %arg11[%c0_141, %c0_142], %377 {strides = array<i32>} : memref<1x1xf32, #tpu.memory_space<vmem>>, vector<1x1xf32>,
    return
  }
}

</mosaic_0001>

<bundles_post_ra>
// kernel: roberta_forward.1
= control target key start
LH: loop header
LB: loop body
LE: loop exit
PB: predicated region body
PF: predicated region fallthrough
CT: control target
= control target key end

     0   :  { %17 = vsyncpa [#allocation3], 0  ;;  %vm52_vm2 = vcmask 130048   ;;  %v3704_v3 = vmov 0   ;;  %s4504_s0 = inlined_call_operand.vmem [shape: s32[24,1], index: 0, kind: input, shape index: {}]   ;;  %s4505_s1 = inlined_call_operand.vmem [shape: f32[1,16], index: 1, kind: input, shape index: {}]   ;;  %s4506_s2 = inlined_call_operand.vmem [shape: f32[32,16], index: 2, kind: input, shape index: {}]   ;;  %s4507_s3 = inlined_call_operand.vmem [shape: f32[24,128], index: 3, kind: input, shape index: {}]   ;;  %s4508_s4 = inlined_call_operand.vmem [shape: f32[144,64], index: 4, kind: input, shape index: {}]   ;;  %s4509_s5 = inlined_call_operand.vmem [shape: f32[2,64,192], index: 5, kind: input, shape index: {}]   ;;  %s4510_s6 = inlined_call_operand.vmem [shape: f32[2,64,64], index: 6, kind: input, shape index: {}]   ;;  %s4511_s7 = inlined_call_operand.vmem [shape: f32[2,64,128], index: 7, kind: input, shape index: {}]   ;;  %s4512_s8 = inlined_call_operand.vmem [shape: f32[2,128,64], index: 8, kind: input, shape index: {}]   ;;  %s4513_s9 = inlined_call_operand.vmem [shape: f32[64,66], index: 9, kind: input, shape index: {}]   ;;  %s4514_s10 = inlined_call_operand.hbm [shape: f32[2,2], index: 10, kind: output, shape index: {0}]   ;;  %s4515_s11 = inlined_call_operand.hbm [shape: f32[1,1], index: 11, kind: output, shape index: {1}]  }
   0x1   :  { %v39_v0 = vld [vmem:[%s4504_s0] sm:$0xff]  ;;  %v40_v1 = vld [vmem:[%s4504_s0 + $0x8] sm:$0xff]  ;;  %3538 = vset.pattern.permute.xlu0 %v3704_v3  ;;  %3539 = vset.pattern.permute.xlu1 %v3704_v3 }
   0x2   :  { %v48_v2 = vld [vmem:[%s4506_s2] sm:$0xff]  ;;  %vm42_vm0 = vcmp.ne.s32.totalorder %v39_v0, 1  ;;  %vm43_vm1 = vcmp.ne.s32.totalorder %v40_v1, 1 }
   0x3   :  { %18 = vsyncpa [#allocation5], 0  ;;  %2966 = vmatprep.mubr.msk.f32.mxu0 %vm52_vm2, %v48_v2  ;;  %143 = vperm.xlu1 %3539, %v39_v0   ;;  %v3705_v4 = vmov 1.0|1.0   ;;  %v49_v5 = vld [vmem:[%s4506_s2 + $0x8] sm:$0xff]  ;;  %v180_v7 = vld [vmem:[%s4508_s4 + $0x70] sm:$0xff]  ;;  %v140_v28 = vlaneseq }
   0x4   :  { %vm3255_vm3 = vmpackc.low %vm43_vm1, %vm42_vm0  ;;  %v179_v6 = vld [vmem:[%s4508_s4 + $0x68] sm:$0xff]  ;;  %v45_v12 = vsel %vm43_vm1, 1, %v3704_v3  ;;  %v44_v14 = vsel %vm42_vm0, 1, %v3704_v3  ;;  %v181_v20 = vld [vmem:[%s4508_s4 + $0x78] sm:$0xff]  ;;  %v3706_v23 = vmov 0.0   ;;  %vm183_vm4 = vcmask 261120  }
   0x5   :  { %3256 = vmatprep.subr.msk.bf16.mxu0 %vm3255_vm3, %v3705_v4  ;;  %v3259_v8 = vpack.c.bf16 %v180_v7, %v179_v6  ;;  %v182_v21 = vld [vmem:[%s4508_s4 + $0x80] sm:$0xff]  ;;  %v167_v26 = vld [vmem:[%s4508_s4 + $0x8] sm:$0xff]  ;;  %v3817_v29 = vand.u32 127, %v140_v28  ;;  %v168_v33 = vld [vmem:[%s4508_s4 + $0x10] sm:$0xff]  ;;  %vm265_vm8 = vcmask 850944   ;;  %vm356_vm10 = vcmask 523264  }
   0x6   :  { %3258 = vmatpush3.bf16.msk.msra.mxu0 %vm3255_vm3, %v3705_v4  ;;  %v3263_v22 = vpack.c.bf16 %v182_v21, %v181_v20  ;;  %v166_v25 = vld [vmem:[%s4508_s4] sm:$0xff]  ;;  %v169_v34 = vld [vmem:[%s4508_s4 + $0x18] sm:$0xff]  ;;  %v171_v40 = vld [vmem:[%s4508_s4 + $0x28] sm:$0xff]  ;;  %s3707_s17 = smov 64   ;;  %vm2411_vm3 = vcmask 1040384  }
   0x7   :  { %146 = vperm.xlu1 %3539, %v40_v1   ;;  %3260 = vmatprep.subr.bf16.mxu1 %v3259_v8  ;;  %v3267_v27 = vpack.c.bf16 %v167_v26, %v166_v25  ;;  %v3271_v36 = vpack.c.bf16 %v169_v34, %v168_v33  ;;  %v170_v39 = vld [vmem:[%s4508_s4 + $0x20] sm:$0xff]  ;;  %v172_v42 = vld [vmem:[%s4508_s4 + $0x30] sm:$0xff]  ;;  %v173_v43 = vld [vmem:[%s4508_s4 + $0x38] sm:$0xff] }
   0x8   :  { %3262 = vmatpush3.bf16.msra.mxu1 %v3259_v8  ;;  %v3275_v41 = vpack.c.bf16 %v171_v40, %v170_v39  ;;  %v3279_v44 = vpack.c.bf16 %v173_v43, %v172_v42  ;;  %v174_v45 = vld [vmem:[%s4508_s4 + $0x40] sm:$0xff]  ;;  %v175_v46 = vld [vmem:[%s4508_s4 + $0x48] sm:$0xff]  ;;  %v176_v48 = vld [vmem:[%s4508_s4 + $0x50] sm:$0xff] }
   0x9   :  { %2967 = vmatmul.mubr.msk.f32.vlgmr.msra.gmra.mrb[0].mxu0 %vm52_vm2, %v49_v5  ;;  %3264 = vmatprep.subr.bf16.mxu1 %v3263_v22  ;;  %v3283_v47 = vpack.c.bf16 %v175_v46, %v174_v45  ;;  %v177_v49 = vld [vmem:[%s4508_s4 + $0x58] sm:$0xff]  ;;  %v178_v52 = vld [vmem:[%s4508_s4 + $0x60] sm:$0xff]  ;;  %v2691_v54 = vld [vmem:[%s4508_s4 + $0x88] ss:$0 sm:$0xff] }
   0xa   :  { %496 = vmatprep.mubr.f32.mxu0 %v3706_v23  ;;  %v3287_v50 = vpack.c.bf16 %v177_v49, %v176_v48  ;;  %v411_v8 = vld [vmem:[%s4509_s5 + $0x8] sm:$0xff]  ;;  %v421_v21 = vld [vmem:[%s4509_s5 + $0x58] sm:$0xff]  ;;  %v420_v25 = vld [vmem:[%s4509_s5 + $0x50] sm:$0xff] }
   0xb   :  { %v419_v20 = vld [vmem:[%s4509_s5 + $0x48] sm:$0xff]  ;;  %v424_v33 = vld [vmem:[%s4509_s5 + $0x70] sm:$0xff]  ;;  %v2692_v43 = vld [vmem:[%s4507_s3] ss:$0 sm:$0xff] }
   0xc   :  { %3266 = vmatpush3.bf16.msra.mxu1 %v3263_v22  ;;  %v3299_v22 = vpack.c.bf16 %v421_v21, %v419_v20  ;;  %v2693_v45 = vld [vmem:[%s4507_s3 + $0x1] ss:$0 sm:$0xff]  ;;  %vm3961_vm11 = vmpackc.low %vm183_vm4, %vm183_vm4 }
   0xd   :  { %3268 = vmatprep.subr.bf16.mxu1 %v3267_v27 }
  0x82   :  { %v144_v31 = vpop.permute.xlu1 %143 }
  0x83   :  { %vm148_vm6 = vcmp.eq.s32.totalorder %v3817_v29, %v144_v31 }
  0x84   :  { %v2683_v37 = vsel %vm148_vm6, 1.0, %v3706_v23 }
  0x86   :  { %v147_v51 = vpop.permute.xlu1 %146 }
  0x87   :  { %vm149_vm9 = vcmp.eq.s32.totalorder %v3817_v29, %v147_v51 }
  0x88   :  { %v2684_v53 = vsel %vm149_vm9, 1.0, %v3706_v23 }
  0xdc   :  { %v2968_v9 = vpop.f32.mrb[0].mxu0 }
  0xdd   :  { %v3523_v10 = vtrunc.f32 %v2968_v9  ;;  %v125_v11 = vpop.f32.mrb[1].mxu0  ;;  %v413_v9 = vld [vmem:[%s4509_s5 + $0x18] sm:$0xff] }
  0xde   :  { %v3521_v13 = vtrunc.f32 %v125_v11  ;;  %v410_v11 = vld [vmem:[%s4509_s5] sm:$0xff] }
  0xdf   :  { %v3524_v15 = vcvt.f32.s32 %v3523_v10  ;;  %v3291_v10 = vpack.c.bf16 %v413_v9, %v411_v8 }
  0xe0   :  { %v3522_v16 = vcvt.f32.s32 %v3521_v13 }
  0xe1   :  { %v137_v17 = vmul.u32 %v3524_v15, %v45_v12  ;;  %v412_v12 = vld [vmem:[%s4509_s5 + $0x10] sm:$0xff]  ;;  %3292 = vmatprep.subr.bf16.mxu0 %v3291_v10  ;;  %v417_v15 = vld [vmem:[%s4509_s5 + $0x38] sm:$0xff]  ;;  %v396_v10 = vld [vmem:[%s4505_s1] sm:$0x1]  ;;  %s3709_s1 = smov 32  }
  0xe2   :  { %v136_v18 = vmul.u32 %v3522_v16, %v44_v14  ;;  %v3293_v13 = vpack.c.bf16 %v412_v12, %v410_v11  ;;  %v415_v14 = vld [vmem:[%s4509_s5 + $0x28] sm:$0xff]  ;;  %v402_v11 = vshrl.u32 %v140_v28, 7  ;;  %vm399_vm12 = vcmp.gt.f32.partialorder %v396_v10, 0.5 }
  0xe3   :  { %v139_v24 = vadd.s32 1, %v137_v17  ;;  %v3295_v16 = vpack.c.bf16 %v417_v15, %v415_v14  ;;  %v414_v17 = vld [vmem:[%s4509_s5 + $0x20] sm:$0xff]  ;;  %v51_v15 = vld [vmem:[%s4506_s2 + $0x18] sm:$0xff]  ;;  %v3708_v28 = vmov -1e+09  }
  0xe4   :  { %v138_v19 = vadd.s32 1, %v136_v18  ;;  %3294 = vmatpush1.bf16.msra.mxu0 %v3293_v13  ;;  %v416_v18 = vld [vmem:[%s4509_s5 + $0x30] sm:$0xff]  ;;  %v403_v12 = vsub.s32 0, %v402_v11  ;;  %v400_v13 = vsel %vm399_vm12, 1, %v3704_v3  ;;  %vm398_vm13 = vcmp.gt.f32.partialorder %v51_v15, 0.5 }
  0xe5   :  { %3296 = vmatprep.subr.bf16.mxu0 %v3295_v16  ;;  %v50_v16 = vld [vmem:[%s4506_s2 + $0x10] sm:$0xff]  ;;  %s3710_s2 = smov 96  }
  0xe6   :  { %155 = vperm.xlu0 %3538, %v138_v19   ;;  %v3297_v19 = vpack.c.bf16 %v416_v18, %v414_v17  ;;  %v404_v14 = vrot.slane %v400_v13, %v403_v12  ;;  %vm397_vm15 = vcmp.gt.f32.partialorder %v50_v16, 0.5 }
  0xe8   :  { %3298 = vmatpush1.bf16.msra.mxu0 %v3297_v19  ;;  %vm405_vm14 = vcmp.eq.s32.totalorder %v404_v14, 1 }
  0xe9   :  { %3300 = vmatprep.subr.bf16.mxu0 %v3299_v22  ;;  %vm407_vm0 = vmand %vm398_vm13, %vm405_vm14 }
  0xea   :  { %158 = vperm.xlu0 %3538, %v139_v24   ;;  %v418_v24 = vld [vmem:[%s4509_s5 + $0x40] sm:$0xff]  ;;  %vm406_vm1 = vmand %vm397_vm15, %vm405_vm14  ;;  %v3982_v18 = vsel %vm407_vm0, 0.0, %v3708_v28 }
  0xeb   :  { %v3301_v26 = vpack.c.bf16 %v420_v25, %v418_v24  ;;  %v3984_v20 = vsel %vm406_vm1, 0.0, %v3708_v28  ;;  %v539_v28 = vld [vmem:[%s4510_s6 + $0x28] sm:$0xff] }
  0xed   :  { %3302 = vmatpush1.bf16.msra.mxu0 %v3301_v26 }
 0x165   :  { %v156_v30 = vpop.permute.xlu0 %155 }
 0x166   :  { %vm160_vm5 = vcmp.eq.s32.totalorder %v3817_v29, %v156_v30  ;;  %v425_v30 = vld [vmem:[%s4509_s5 + $0x78] sm:$0xff] }
 0x167   :  { %v2685_v32 = vsel %vm160_vm5, 1.0, %v3706_v23 }
 0x168   :  { %2977 = vmatprep.mubr.msk.f32.mxu1 %vm183_vm4, %v2685_v32  ;;  %v422_v32 = vld [vmem:[%s4509_s5 + $0x60] sm:$0xff] }
 0x169   :  { %v159_v35 = vpop.permute.xlu0 %158  ;;  %v3305_v34 = vpack.c.bf16 %v424_v33, %v422_v32 }
 0x16a   :  { %vm161_vm7 = vcmp.eq.s32.totalorder %v3817_v29, %v159_v35  ;;  %v2697_v35 = vld [vmem:[%s4507_s3 + $0x3] ss:$0 sm:$0xff] }
 0x16b   :  { %v2686_v38 = vsel %vm161_vm7, 1.0, %v3706_v23 }
 0x16c   :  { %2978 = vmatmul.mubr.msk.f32.vlgmr.msra.gmra.mrb[0].mxu1 %vm183_vm4, %v2686_v38 }
 0x16d   :  { %3270 = vmatpush3.bf16.msra.mxu1 %v3267_v27  ;;  %3006 = vmatprep.mubr.msk.f32.mxu1 %vm265_vm8, %v2683_v37  ;;  %v423_v27 = vld [vmem:[%s4509_s5 + $0x68] sm:$0xff] }
 0x16e   :  { %3272 = vmatprep.subr.bf16.mxu1 %v3271_v36  ;;  %v3303_v31 = vpack.c.bf16 %v425_v30, %v423_v27 }
 0x170   :  { %3304 = vmatprep.subr.bf16.mxu0 %v3303_v31 }
 0x171   :  { %3274 = vmatpush3.bf16.msra.mxu1 %v3271_v36  ;;  %3306 = vmatpush1.bf16.msra.mxu0 %v3305_v34 }
 0x172   :  { %3276 = vmatprep.subr.bf16.mxu1 %v3275_v41 }
 0x175   :  { %3278 = vmatpush3.bf16.msra.mxu1 %v3275_v41 }
 0x176   :  { %3280 = vmatprep.subr.bf16.mxu1 %v3279_v44 }
 0x179   :  { %3282 = vmatpush3.bf16.msra.mxu1 %v3279_v44 }
 0x17a   :  { %3284 = vmatprep.subr.bf16.mxu1 %v3283_v47 }
 0x17d   :  { %3286 = vmatpush3.bf16.msra.mxu1 %v3283_v47 }
 0x17e   :  { %3288 = vmatprep.subr.bf16.mxu1 %v3287_v50 }
 0x181   :  { %3290 = vmatpush3.bf16.msra.mxu1 %v3287_v50 }
 0x182   :  { %3004 = vmatprep.subr.mxu1 %v178_v52 }
 0x185   :  { %3005 = vmatpush3.msra.mxu1 %v178_v52  ;;  %v2696_v52 = vld [vmem:[%s4507_s3 + $0x2] ss:$0 sm:$0xff] }
 0x186   :  { %3007 = vmatmul.mubr.msk.f32.vlgmr.msra.gmra.mrb[0].mxu1 %vm265_vm8, %v2684_v53 }
 0x259   :  { %v3008_v55 = vpop.f32.mrb[0].mxu1 }
 0x25a   :  { %v353_v56 = vadd.f32 %v3008_v55, %v2691_v54  ;;  %v338_v57 = vpop.f32.mrb[1].mxu1 }
 0x25b   :  { %v352_v58 = vadd.f32 %v2691_v54, %v338_v57  ;;  %v2698_v57 = vld [vmem:[%s4507_s3 + $0x4] ss:$0 sm:$0xff] }
 0x25c   :  { %v360_v59 = vsel %vm356_vm10, %v353_v56, 0.0 }
 0x25d   :  { %361 = vadd.xlane.f32.xlu1 %v360_v59  ;;  %v357_v60 = vsel %vm356_vm10, %v352_v58, 0.0 }
 0x25e   :  { %358 = vadd.xlane.f32.xlu0 %v357_v60 }
 0x26e   :  { %522 = vrot.lane.b32.xlu1 %v2697_v35, %s3707_s17 }
 0x2ea   :  { %v362_v61 = vpop.xlane.xlu1 %361 }
 0x2eb   :  { %v365_v62 = vmul.f32 0.015625, %v362_v61  ;;  %v359_v63 = vpop.xlane.xlu0 %358 }
 0x2ec   :  { %v364_v0 = vmul.f32 0.015625, %v359_v63 }
 0x2ed   :  { %v367_v1 = vsub.f32 %v353_v56, %v365_v62 }
 0x2ee   :  { %v366_v2 = vsub.f32 %v352_v58, %v364_v0  ;;  %v523_v56 = vpop.permute.xlu1 %522 }
 0x2ef   :  { %v369_v6 = vmul.f32 %v367_v1, %v367_v1 }
 0x2f0   :  { %v368_v4 = vmul.f32 %v366_v2, %v366_v2 }
 0x2f1   :  { %v373_v7 = vsel %vm356_vm10, %v369_v6, 0.0 }
 0x2f2   :  { %v370_v5 = vsel %vm356_vm10, %v368_v4, 0.0 }
 0x2f3   :  { %371 = vadd.xlane.f32.xlu0 %v370_v5 }
 0x2f7   :  { %374 = vadd.xlane.f32.xlu0 %v373_v7 }
 0x380   :  { %v372_v36 = vpop.xlane.xlu0 %371 }
 0x381   :  { %v376_v37 = vmul.f32 0.015625, %v372_v36 }
 0x383   :  { %v378_v38 = vadd.f32 1e-05, %v376_v37 }
 0x384   :  { %v375_v39 = vpop.xlane.xlu0 %374 }
 0x385   :  { %3590 = vrsqrt.f32 %v378_v38  ;;  %v377_v40 = vmul.f32 0.015625, %v375_v39 }
 0x387   :  { %v379_v41 = vadd.f32 1e-05, %v377_v40 }
 0x389   :  { %3592 = vrsqrt.f32 %v379_v41 }
 0x38f   :  { %v3591_v42 = vpop.eup %3590 }
 0x390   :  { %v382_v44 = vmul.f32 %v3591_v42, %v366_v2 }
 0x392   :  { %v388_v46 = vmul.f32 %v2692_v43, %v382_v44 }
 0x393   :  { %v3593_v47 = vpop.eup %3592 }
 0x394   :  { %v3929_v48 = vadd.f32 %v2693_v45, %v388_v46  ;;  %v383_v49 = vmul.f32 %v3593_v47, %v367_v1 }
 0x396   :  { %2694 = vmatmul.mubr.msk.f32.vlgmr.msra.gmra.mrb[2].mxu0 %vm356_vm10, %v3929_v48  ;;  %v389_v50 = vmul.f32 %v2692_v43, %v383_v49 }
 0x397   :  { %502 = vmatprep.mubr.f32.mxu0 %v3706_v23 }
 0x398   :  { %v3934_v51 = vadd.f32 %v2693_v45, %v389_v50 }
 0x39a   :  { %2695 = vmatmul.mubr.msk.f32.gmra.mrb[4].mxu0 %vm356_vm10, %v3934_v51 }
 0x469   :  { %v498_v53 = vpop.f32.mrb[2].mxu0 }
 0x46a   :  { %v3941_v54 = vadd.f32 %v2696_v52, %v498_v53  ;;  %v500_v55 = vpop.f32.mrb[3].mxu0  ;;  %v525_v59 = vadd.f32 %v523_v56, %v498_v53 }
 0x46b   :  { %v3950_v63 = vadd.f32 %v2698_v57, %v500_v55 }
 0x46c   :  { %3013 = vmatprep.mubr.msk.f32.mxu0 %vm183_vm4, %v3941_v54 }
 0x46d   :  { %v504_v58 = vpop.f32.mrb[4].mxu0 }
 0x46e   :  { %v526_v60 = vadd.f32 %v523_v56, %v504_v58  ;;  %v3948_v61 = vadd.f32 %v2696_v52, %v504_v58  ;;  %v506_v62 = vpop.f32.mrb[5].mxu0 }
 0x46f   :  { %v3952_v0 = vadd.f32 %v2698_v57, %v506_v62 }
 0x470   :  { %v3545_v1 = vpack.i.bf16 %v526_v60, %v525_v59 }
 0x471   :  { %v3550_v2 = vpack.i.bf16 %v3952_v0, %v3950_v63  ;;  %v3313_v4 = vpack.c.bf16 %v3952_v0, %v3950_v63  ;;  %v540_v0 = vld [vmem:[%s4510_s6 + $0x30] sm:$0xff] }
 0x472   :  { %3541 = vrot.lane.b32.xlu0 %v3545_v1, %s3707_s17 }
 0x4e4   :  { %v3542_v5 = vpop.permute.xlu0 %3541 }
 0x4e5   :  { %v3544_v6 = vunpack.i.h.bf16 %v3542_v5  ;;  %v3543_v7 = vunpack.i.l.bf16 %v3542_v5 }
 0x4e7   :  { %v3307_v9 = vpack.c.bf16 %v3544_v6, %v3543_v7 }
 0x4e9   :  { %3309 = vmatprep.subr.msk.bf16.mxu0 %vm3961_vm11, %v3307_v9 }
 0x4ea   :  { %3312 = vmatpush3.bf16.xpose.msk.msra.mxu0 %vm3961_vm11, %v3307_v9 }
 0x4eb   :  { %3314 = vmatprep.subr.bf16.mxu0 %v3313_v4 }
 0x4f1   :  { %3014 = vmatmul.mubr.msk.f32.vlgmr.msra.gmra.mrb[6].mxu0 %vm183_vm4, %v3948_v61 }
 0x4f2   :  { %3316 = vmatpush3.bf16.msra.mxu0 %v3313_v4 }
 0x5c4   :  { %v3015_v17 = vpop.f32.mrb[6].mxu0 }
 0x5c5   :  { %v634_v19 = vmul.f32 0.17677669, %v3015_v17  ;;  %v624_v3 = vpop.f32.mrb[7].mxu0  ;;  %v538_v17 = vld [vmem:[%s4510_s6 + $0x20] sm:$0xff] }
 0x5c6   :  { %v633_v21 = vmul.f32 0.17677669, %v624_v3 }
 0x5c7   :  { %v636_v22 = vadd.f32 %v634_v19, %v3982_v18 }
 0x5c8   :  { %v635_v24 = vadd.f32 %v633_v21, %v3984_v20 }
 0x5c9   :  { %v640_v25 = vsel %vm52_vm2, %v636_v22, -inf }
 0x5ca   :  { %641 = vmax.xlane.f32.xlu0 %v640_v25  ;;  %v637_v26 = vsel %vm52_vm2, %v635_v24, -inf }
 0x5cb   :  { %638 = vmax.xlane.f32.xlu1 %v637_v26 }
 0x5dc   :  { %3546 = vrot.lane.b32.xlu1 %v3545_v1, %s3709_s1 }
 0x657   :  { %v642_v27 = vpop.xlane.xlu0 %641 }
 0x658   :  { %v644_v30 = vsub.f32 %v636_v22, %v642_v27  ;;  %v639_v31 = vpop.xlane.xlu1 %638  ;;  %v3327_v22 = vpack.c.bf16 %v539_v28, %v538_v17  ;;  %v2716_v17 = vld [vmem:[%s4507_s3 + $0x6] ss:$0 sm:$0xff] }
 0x659   :  { %v643_v32 = vsub.f32 %v635_v24, %v639_v31  ;;  %v535_v31 = vld [vmem:[%s4510_s6 + $0x8] sm:$0xff] }
 0x65a   :  { %v647_v33 = vmul.f32 1.442695, %v644_v30  ;;  %v534_v30 = vld [vmem:[%s4510_s6] sm:$0xff] }
 0x65b   :  { %v645_v34 = vmul.f32 1.442695, %v643_v32  ;;  %v3335_v32 = vpack.c.bf16 %v535_v31, %v534_v30  ;;  %v1272_v30 = vld [vmem:[%s4512_s8 + $0x18] sm:$0xff] }
 0x65c   :  { %3594 = vpow2.f32 %v647_v33  ;;  %v3547_v35 = vpop.permute.xlu1 %3546  ;;  %v536_v33 = vld [vmem:[%s4510_s6 + $0x10] sm:$0xff] }
 0x65d   :  { %3596 = vpow2.f32 %v645_v34  ;;  %v3549_v36 = vunpack.i.h.bf16 %v3547_v35  ;;  %v3548_v37 = vunpack.i.l.bf16 %v3547_v35  ;;  %v537_v34 = vld [vmem:[%s4510_s6 + $0x18] sm:$0xff] }
 0x65f   :  { %v3317_v38 = vpack.c.bf16 %v3549_v36, %v3548_v37  ;;  %v3339_v37 = vpack.c.bf16 %v537_v34, %v536_v33  ;;  %v1274_v33 = vld [vmem:[%s4512_s8 + $0x28] sm:$0xff] }
 0x661   :  { %3319 = vmatprep.subr.msk.bf16.mxu0 %vm3961_vm11, %v3317_v38 }
 0x666   :  { %v3595_v39 = vpop.eup %3594 }
 0x667   :  { %v3597_v40 = vpop.eup %3596  ;;  %v652_v41 = vsel %vm52_vm2, %v3595_v39, 0.0 }
 0x668   :  { %653 = vadd.xlane.f32.xlu0 %v652_v41  ;;  %v649_v42 = vsel %vm52_vm2, %v3597_v40, 0.0 }
 0x669   :  { %650 = vadd.xlane.f32.xlu1 %v649_v42 }
 0x67a   :  { %742 = vrot.lane.b32.xlu1 %v3948_v61, %s3710_s2 }
 0x67e   :  { %740 = vrot.lane.b32.xlu0 %v3941_v54, %s3710_s2 }
 0x6f5   :  { %v654_v43 = vpop.xlane.xlu0 %653 }
 0x6f6   :  { %3598 = vrcp.f32 %v654_v43  ;;  %v651_v44 = vpop.xlane.xlu1 %650 }
 0x6f7   :  { %3600 = vrcp.f32 %v651_v44 }
 0x6f9   :  { %v741_v50 = vpop.permute.xlu0 %740 }
 0x6fa   :  { %v743_v52 = vpop.permute.xlu1 %742 }
 0x700   :  { %v3599_v45 = vpop.eup %3598 }
 0x701   :  { %v3601_v46 = vpop.eup %3600  ;;  %v658_v49 = vmul.f32 %v3599_v45, %v3595_v39 }
 0x702   :  { %v657_v47 = vmul.f32 %v3601_v46, %v3597_v40 }
 0x704   :  { %3020 = vmatprep.mubr.msk.f32.mxu0 %vm52_vm2, %v657_v47 }
 0x705   :  { %3021 = vmatmul.mubr.msk.f32.vlgmr.msra.gmra.mrb[8].mxu0 %vm52_vm2, %v658_v49 }
 0x706   :  { %3322 = vmatpush3.bf16.xpose.msk.msra.mxu0 %vm3961_vm11, %v3317_v38  ;;  %3027 = vmatprep.mubr.msk.f32.mxu0 %vm183_vm4, %v741_v50  ;;  %v2715_v38 = vld [vmem:[%s4507_s3 + $0x5] ss:$0 sm:$0xff] }
 0x70d   :  { %3028 = vmatmul.mubr.msk.f32.vlgmr.msra.gmra.mrb[10].mxu0 %vm183_vm4, %v743_v52 }
 0x7d8   :  { %v4005_v53 = vpop.f32.mrb[8].mxu0 }
 0x7d9   :  { %v4007_v54 = vpop.f32.mrb[9].mxu0 }
 0x7e0   :  { %v3029_v55 = vpop.f32.mrb[10].mxu0 }
 0x7e1   :  { %v832_v56 = vmul.f32 0.17677669, %v3029_v55  ;;  %v822_v57 = vpop.f32.mrb[11].mxu0 }
 0x7e2   :  { %v831_v58 = vmul.f32 0.17677669, %v822_v57 }
 0x7e3   :  { %v834_v59 = vadd.f32 %v832_v56, %v3982_v18 }
 0x7e4   :  { %v833_v60 = vadd.f32 %v831_v58, %v3984_v20  ;;  %v1158_v58 = vld [vmem:[%s4511_s7 + $0x8] sm:$0xff] }
 0x7e5   :  { %v838_v61 = vsel %vm52_vm2, %v834_v59, -inf }
 0x7e6   :  { %839 = vmax.xlane.f32.xlu0 %v838_v61  ;;  %v835_v62 = vsel %vm52_vm2, %v833_v60, -inf  ;;  %v1160_v61 = vld [vmem:[%s4511_s7 + $0x18] sm:$0xff] }
 0x7e7   :  { %836 = vmax.xlane.f32.xlu1 %v835_v62 }
 0x873   :  { %v840_v1 = vpop.xlane.xlu0 %839 }
 0x874   :  { %v842_v4 = vsub.f32 %v834_v59, %v840_v1  ;;  %v837_v5 = vpop.xlane.xlu1 %836  ;;  %v1161_v1 = vld [vmem:[%s4511_s7 + $0x20] sm:$0xff] }
 0x875   :  { %v841_v6 = vsub.f32 %v833_v60, %v837_v5  ;;  %v1159_v60 = vld [vmem:[%s4511_s7 + $0x10] sm:$0xff] }
 0x876   :  { %v845_v7 = vmul.f32 1.442695, %v842_v4  ;;  %v3347_v62 = vpack.c.bf16 %v1160_v61, %v1159_v60  ;;  %v1162_v4 = vld [vmem:[%s4511_s7 + $0x28] sm:$0xff] }
 0x877   :  { %v843_v9 = vmul.f32 1.442695, %v841_v6  ;;  %v3351_v5 = vpack.c.bf16 %v1162_v4, %v1161_v1  ;;  %v1163_v6 = vld [vmem:[%s4511_s7 + $0x30] sm:$0xff] }
 0x878   :  { %3602 = vpow2.f32 %v845_v7  ;;  %v1164_v7 = vld [vmem:[%s4511_s7 + $0x38] sm:$0xff] }
 0x879   :  { %3604 = vpow2.f32 %v843_v9  ;;  %v3355_v9 = vpack.c.bf16 %v1164_v7, %v1163_v6 }
 0x882   :  { %v3603_v10 = vpop.eup %3602 }
 0x883   :  { %v3605_v11 = vpop.eup %3604  ;;  %v850_v12 = vsel %vm52_vm2, %v3603_v10, 0.0 }
 0x884   :  { %851 = vadd.xlane.f32.xlu1 %v850_v12  ;;  %v847_v13 = vsel %vm52_vm2, %v3605_v11, 0.0 }
 0x885   :  { %848 = vadd.xlane.f32.xlu0 %v847_v13 }
 0x89b   :  { %3551 = vrot.lane.b32.xlu0 %v3550_v2, %s3710_s2  ;;  %v541_v2 = vld [vmem:[%s4510_s6 + $0x38] sm:$0xff] }
 0x89c   :  { %v3331_v27 = vpack.c.bf16 %v541_v2, %v540_v0 }
 0x911   :  { %v852_v14 = vpop.xlane.xlu1 %851 }
 0x912   :  { %3606 = vrcp.f32 %v852_v14  ;;  %v849_v15 = vpop.xlane.xlu0 %848 }
 0x913   :  { %3608 = vrcp.f32 %v849_v15 }
 0x916   :  { %v3552_v16 = vpop.permute.xlu0 %3551 }
 0x917   :  { %v3554_v19 = vunpack.i.h.bf16 %v3552_v16  ;;  %v3553_v3 = vunpack.i.l.bf16 %v3552_v16 }
 0x919   :  { %v3323_v21 = vpack.c.bf16 %v3554_v19, %v3553_v3  ;;  %v2717_v19 = vld [vmem:[%s4507_s3 + $0x7] ss:$0 sm:$0xff] }
 0x91b   :  { %3324 = vmatprep.subr.bf16.mxu1 %v3323_v21 }
 0x91c   :  { %v3607_v63 = vpop.eup %3606  ;;  %3326 = vmatpush3.bf16.msra.mxu1 %v3323_v21 }
 0x91d   :  { %v3609_v24 = vpop.eup %3608  ;;  %3328 = vmatprep.subr.bf16.mxu1 %v3327_v22  ;;  %v856_v26 = vmul.f32 %v3607_v63, %v3603_v10 }
 0x91e   :  { %v855_v25 = vmul.f32 %v3609_v24, %v3605_v11  ;;  %v1269_v24 = vld [vmem:[%s4512_s8] sm:$0xff] }
 0x920   :  { %3034 = vmatprep.mubr.msk.f32.mxu1 %vm52_vm2, %v855_v25  ;;  %v1270_v25 = vld [vmem:[%s4512_s8 + $0x8] sm:$0xff] }
 0x921   :  { %3035 = vmatmul.mubr.msk.f32.vlgmr.msra.gmra.mrb[2].mxu1 %vm52_vm2, %v856_v26  ;;  %v3359_v26 = vpack.c.bf16 %v1270_v25, %v1269_v24 }
 0x922   :  { %3330 = vmatpush3.bf16.msra.mxu1 %v3327_v22 }
 0x923   :  { %3332 = vmatprep.subr.bf16.mxu1 %v3331_v27 }
 0x926   :  { %3334 = vmatpush3.bf16.msra.mxu1 %v3331_v27  ;;  %v1271_v27 = vld [vmem:[%s4512_s8 + $0x10] sm:$0xff] }
 0x927   :  { %3336 = vmatprep.subr.bf16.mxu1 %v3335_v32  ;;  %v3363_v31 = vpack.c.bf16 %v1272_v30, %v1271_v27 }
 0x9f4   :  { %v3036_v35 = vpop.f32.mrb[2].mxu1 }
 0x9f5   :  { %v937_v36 = vpop.f32.mrb[3].mxu1 }
 0x9f6   :  { %3045 = vmatprep.mubr.msk.f32.mxu1 %vm183_vm4, %v937_v36  ;;  %v1276_v36 = vld [vmem:[%s4512_s8 + $0x38] sm:$0xff] }
 0x9f7   :  { %3046 = vmatmul.mubr.msk.f32.vlgmr.msra.gmra.mrb[4].mxu1 %vm183_vm4, %v3036_v35  ;;  %v1275_v35 = vld [vmem:[%s4512_s8 + $0x30] sm:$0xff] }
 0x9f8   :  { %3338 = vmatpush3.bf16.msra.mxu1 %v3335_v32  ;;  %3056 = vmatprep.mubr.msk.f32.mxu1 %vm183_vm4, %v4007_v54  ;;  %v1273_v32 = vld [vmem:[%s4512_s8 + $0x20] sm:$0xff] }
 0x9f9   :  { %3340 = vmatprep.subr.bf16.mxu1 %v3339_v37  ;;  %v3367_v34 = vpack.c.bf16 %v1274_v33, %v1273_v32 }
 0x9fc   :  { %3342 = vmatpush3.bf16.msra.mxu1 %v3339_v37  ;;  %v3371_v37 = vpack.c.bf16 %v1276_v36, %v1275_v35  ;;  %v2724_v36 = vld [vmem:[%s4509_s5 + $0x80] sm:$0xff] }
 0x9fd   :  { %3360 = vmatprep.subr.bf16.mxu1 %v3359_v26 }
 0x9ff   :  { %3057 = vmatmul.mubr.msk.f32.vlgmr.msra.gmra.mrb[4].mxu1 %vm183_vm4, %v4005_v53 }
 0xa00   :  { %3362 = vmatpush3.bf16.msra.mxu1 %v3359_v26 }
 0xa01   :  { %3364 = vmatprep.subr.bf16.mxu1 %v3363_v31 }
 0xa04   :  { %3366 = vmatpush3.bf16.msra.mxu1 %v3363_v31 }
 0xa05   :  { %3368 = vmatprep.subr.bf16.mxu1 %v3367_v34 }
 0xa08   :  { %3370 = vmatpush3.bf16.msra.mxu1 %v3367_v34  ;;  %v2727_v34 = vld [vmem:[%s4509_s5 + $0x98] sm:$0xff] }
 0xa09   :  { %3372 = vmatprep.subr.bf16.mxu1 %v3371_v37 }
 0xa0c   :  { %3374 = vmatpush3.bf16.msra.mxu1 %v3371_v37  ;;  %v2726_v37 = vld [vmem:[%s4509_s5 + $0x90] sm:$0xff] }
 0xad2   :  { %v3058_v39 = vpop.f32.mrb[4].mxu1 }
 0xad3   :  { %v1099_v40 = vpop.f32.mrb[5].mxu1  ;;  %v1114_v41 = vadd.f32 %v3058_v39, %v2715_v38  ;;  %v1278_v39 = vld [vmem:[%s4512_s8 + $0x48] sm:$0xff] }
 0xad4   :  { %v1113_v42 = vadd.f32 %v2715_v38, %v1099_v40  ;;  %v1277_v38 = vld [vmem:[%s4512_s8 + $0x40] sm:$0xff]  ;;  %v1279_v40 = vld [vmem:[%s4512_s8 + $0x50] sm:$0xff] }
 0xad5   :  { %v1116_v45 = vadd.f32 %v1114_v41, %v3934_v51  ;;  %v1157_v51 = vld [vmem:[%s4511_s7] sm:$0xff]  ;;  %v3375_v41 = vpack.c.bf16 %v1278_v39, %v1277_v38  ;;  %v3393_v38 = vpack.c.bf16 %v2726_v37, %v2724_v36  ;;  %v2729_v39 = vld [vmem:[%s4509_s5 + $0xa8] sm:$0xff] }
 0xad6   :  { %v1115_v43 = vadd.f32 %v1113_v42, %v3929_v48  ;;  %v3343_v59 = vpack.c.bf16 %v1158_v58, %v1157_v51  ;;  %v1280_v42 = vld [vmem:[%s4512_s8 + $0x58] sm:$0xff] }
 0xad7   :  { %v1122_v46 = vsel %vm356_vm10, %v1116_v45, 0.0  ;;  %3376 = vmatprep.subr.bf16.mxu1 %v3375_v41 }
 0xad8   :  { %v1119_v44 = vsel %vm356_vm10, %v1115_v43, 0.0  ;;  %3344 = vmatprep.subr.bf16.mxu0 %v3343_v59  ;;  %3378 = vmatpush3.bf16.msra.mxu1 %v3375_v41 }
 0xad9   :  { %1120 = vadd.xlane.f32.xlu1 %v1119_v44  ;;  %3346 = vmatpush3.bf16.msra.mxu0 %v3343_v59  ;;  %v1281_v44 = vld [vmem:[%s4512_s8 + $0x60] sm:$0xff] }
 0xada   :  { %3348 = vmatprep.subr.bf16.mxu0 %v3347_v62 }
 0xadd   :  { %1123 = vadd.xlane.f32.xlu1 %v1122_v46  ;;  %3350 = vmatpush3.bf16.msra.mxu0 %v3347_v62 }
 0xade   :  { %3352 = vmatprep.subr.bf16.mxu0 %v3351_v5 }
 0xae1   :  { %3354 = vmatpush3.bf16.msra.mxu0 %v3351_v5 }
 0xae2   :  { %3356 = vmatprep.subr.bf16.mxu0 %v3355_v9 }
 0xae5   :  { %3358 = vmatpush3.bf16.msra.mxu0 %v3355_v9 }
 0xb66   :  { %v1121_v47 = vpop.xlane.xlu1 %1120 }
 0xb67   :  { %v1125_v49 = vmul.f32 0.015625, %v1121_v47  ;;  %v1283_v47 = vld [vmem:[%s4512_s8 + $0x70] sm:$0xff] }
 0xb69   :  { %v1127_v50 = vsub.f32 %v1115_v43, %v1125_v49  ;;  %v3379_v43 = vpack.c.bf16 %v1280_v42, %v1279_v40  ;;  %v1284_v49 = vld [vmem:[%s4512_s8 + $0x78] sm:$0xff]  ;;  %v2728_v42 = vld [vmem:[%s4509_s5 + $0xa0] sm:$0xff] }
 0xb6a   :  { %v1124_v52 = vpop.xlane.xlu1 %1123  ;;  %v2731_v40 = vld [vmem:[%s4509_s5 + $0xb8] sm:$0xff] }
 0xb6b   :  { %v1126_v53 = vmul.f32 0.015625, %v1124_v52  ;;  %v1129_v54 = vmul.f32 %v1127_v50, %v1127_v50  ;;  %3380 = vmatprep.subr.bf16.mxu1 %v3379_v43  ;;  %v2718_v52 = vld [vmem:[%s4507_s3 + $0x8] ss:$0 sm:$0xff]  ;;  %v3395_v41 = vpack.c.bf16 %v2731_v40, %v2729_v39 }
 0xb6c   :  { %3382 = vmatpush3.bf16.msra.mxu1 %v3379_v43  ;;  %v2730_v43 = vld [vmem:[%s4509_s5 + $0xb0] sm:$0xff] }
 0xb6d   :  { %v1128_v55 = vsub.f32 %v1116_v45, %v1126_v53  ;;  %v1131_v56 = vsel %vm356_vm10, %v1129_v54, 0.0  ;;  %v1282_v45 = vld [vmem:[%s4512_s8 + $0x68] sm:$0xff] }
 0xb6e   :  { %1132 = vadd.xlane.f32.xlu1 %v1131_v56  ;;  %v3383_v46 = vpack.c.bf16 %v1282_v45, %v1281_v44  ;;  %v3397_v44 = vpack.c.bf16 %v2730_v43, %v2728_v42  ;;  %v2733_v45 = vld [vmem:[%s4509_s5 + $0xc8] sm:$0xff] }
 0xb6f   :  { %v1130_v57 = vmul.f32 %v1128_v55, %v1128_v55 }
 0xb70   :  { %3384 = vmatprep.subr.bf16.mxu1 %v3383_v46 }
 0xb71   :  { %v1134_v48 = vsel %vm356_vm10, %v1130_v57, 0.0  ;;  %3386 = vmatpush3.bf16.msra.mxu1 %v3383_v46  ;;  %v2735_v46 = vld [vmem:[%s4509_s5 + $0xd8] sm:$0xff] }
 0xb72   :  { %1135 = vadd.xlane.f32.xlu1 %v1134_v48 }
 0xbfb   :  { %v1133_v10 = vpop.xlane.xlu1 %1132 }
 0xbfc   :  { %v1137_v11 = vmul.f32 0.015625, %v1133_v10 }
 0xbfe   :  { %v1139_v12 = vadd.f32 1e-05, %v1137_v11 }
 0xbff   :  { %v1136_v13 = vpop.xlane.xlu1 %1135 }
 0xc00   :  { %3610 = vrsqrt.f32 %v1139_v12  ;;  %v1138_v14 = vmul.f32 0.015625, %v1136_v13 }
 0xc02   :  { %v1140_v15 = vadd.f32 1e-05, %v1138_v14  ;;  %v2721_v14 = vld [vmem:[%s4507_s3 + $0x9] ss:$0 sm:$0xff] }
 0xc04   :  { %3612 = vrsqrt.f32 %v1140_v15 }
 0xc0a   :  { %v3611_v16 = vpop.eup %3610 }
 0xc0b   :  { %v1143_v28 = vmul.f32 %v3611_v16, %v1127_v50  ;;  %v3387_v50 = vpack.c.bf16 %v1284_v49, %v1283_v47  ;;  %v3399_v47 = vpack.c.bf16 %v2735_v46, %v2733_v45  ;;  %v2732_v49 = vld [vmem:[%s4509_s5 + $0xc0] sm:$0xff] }
 0xc0d   :  { %v1149_v3 = vmul.f32 %v2716_v17, %v1143_v28  ;;  %3388 = vmatprep.subr.bf16.mxu1 %v3387_v50 }
 0xc0e   :  { %v3613_v21 = vpop.eup %3612  ;;  %3390 = vmatpush3.bf16.msra.mxu1 %v3387_v50  ;;  %v2734_v50 = vld [vmem:[%s4509_s5 + $0xd0] sm:$0xff] }
 0xc0f   :  { %v1144_v22 = vmul.f32 %v3613_v21, %v1128_v55  ;;  %v4090_v63 = vadd.f32 %v2717_v19, %v1149_v3 }
 0xc11   :  { %v1150_v0 = vmul.f32 %v2716_v17, %v1144_v22  ;;  %3075 = vmatprep.mubr.msk.f32.mxu0 %vm356_vm10, %v4090_v63 }
 0xc13   :  { %v4094_v2 = vadd.f32 %v2717_v19, %v1150_v0 }
 0xc15   :  { %3076 = vmatmul.mubr.msk.f32.vlgmr.msra.gmra.mrb[12].mxu0 %vm356_vm10, %v4094_v2 }
 0xc16   :  { %1494 = vmatprep.mubr.f32.mxu0 %v3706_v23 }
 0xce8   :  { %v3077_v53 = vpop.f32.mrb[12].mxu0 }
 0xce9   :  { %v1248_v54 = vadd.f32 %v3077_v53, %v2718_v52  ;;  %v1242_v55 = vpop.f32.mrb[13].mxu0  ;;  %v2737_v53 = vld [vmem:[%s4509_s5 + $0xe8] sm:$0xff] }
 0xcea   :  { %v1243_v56 = vadd.f32 %v2718_v52, %v1242_v55  ;;  %v3401_v52 = vpack.c.bf16 %v2734_v50, %v2732_v49 }
 0xceb   :  { %v1252_v57 = vmul.f32 %v1248_v54, %v1248_v54 }
 0xcec   :  { %v1251_v48 = vmul.f32 %v1243_v56, %v1243_v56 }
 0xced   :  { %v1254_v51 = vmul.f32 %v1252_v57, %v1248_v54  ;;  %v2738_v57 = vld [vmem:[%s4509_s5 + $0xf0] sm:$0xff] }
 0xcee   :  { %v1253_v58 = vmul.f32 %v1251_v48, %v1243_v56 }
 0xcef   :  { %v1256_v59 = vmul.f32 0.044715, %v1254_v51  ;;  %v2743_v51 = vld [vmem:[%s4507_s3 + $0xd] ss:$0 sm:$0xff] }
 0xcf0   :  { %v1255_v60 = vmul.f32 0.044715, %v1253_v58 }
 0xcf1   :  { %v1258_v61 = vadd.f32 %v1256_v59, %v1248_v54 }
 0xcf2   :  { %v1257_v62 = vadd.f32 %v1255_v60, %v1243_v56 }
 0xcf3   :  { %v1260_v1 = vmul.f32 0.7978846, %v1258_v61 }
 0xcf4   :  { %v1259_v4 = vmul.f32 0.7978846, %v1257_v62 }
 0xcf5   :  { %3614 = vtanh.f32 %v1260_v1 }
 0xcf6   :  { %3616 = vtanh.f32 %v1259_v4 }
 0xcff   :  { %v3615_v5 = vpop.eup %3614 }
 0xd00   :  { %v3617_v6 = vpop.eup %3616  ;;  %v1264_v7 = vadd.f32 1.0, %v3615_v5  ;;  %v2722_v5 = vld [vmem:[%s4507_s3 + $0xa] ss:$0 sm:$0xff] }
 0xd01   :  { %v1263_v9 = vadd.f32 1.0, %v3617_v6 }
 0xd02   :  { %v1266_v10 = vmul.f32 0.5, %v1264_v7  ;;  %v2723_v7 = vld [vmem:[%s4507_s3 + $0xb] ss:$0 sm:$0xff] }
 0xd03   :  { %v1265_v11 = vmul.f32 0.5, %v1263_v9 }
 0xd04   :  { %v1268_v13 = vmul.f32 %v1266_v10, %v1248_v54  ;;  %v2739_v54 = vld [vmem:[%s4509_s5 + $0xf8] sm:$0xff] }
 0xd05   :  { %v1267_v12 = vmul.f32 %v1265_v11, %v1243_v56  ;;  %v3403_v55 = vpack.c.bf16 %v2739_v54, %v2737_v53  ;;  %v2736_v56 = vld [vmem:[%s4509_s5 + $0xe0] sm:$0xff] }
 0xd06   :  { %v3405_v48 = vpack.c.bf16 %v2738_v57, %v2736_v56 }
 0xd07   :  { %3110 = vmatprep.mubr.f32.mxu1 %v1267_v12 }
 0xd08   :  { %3111 = vmatmul.mubr.f32.vlgmr.msra.gmra.mrb[6].mxu1 %v1268_v13 }
 0xddb   :  { %v3112_v15 = vpop.f32.mrb[6].mxu1 }
 0xddc   :  { %v1356_v16 = vpop.f32.mrb[7].mxu1  ;;  %v1362_v17 = vadd.f32 %v3112_v15, %v2721_v14  ;;  %v2742_v15 = vld [vmem:[%s4507_s3 + $0xc] ss:$0 sm:$0xff] }
 0xddd   :  { %v1357_v28 = vadd.f32 %v2721_v14, %v1356_v16 }
 0xdde   :  { %v1366_v21 = vadd.f32 %v1362_v17, %v4094_v2  ;;  %v2725_v2 = vld [vmem:[%s4509_s5 + $0x88] sm:$0xff] }
 0xddf   :  { %v1365_v19 = vadd.f32 %v1357_v28, %v4090_v63  ;;  %v3391_v35 = vpack.c.bf16 %v2727_v34, %v2725_v2 }
 0xde0   :  { %v1372_v22 = vsel %vm356_vm10, %v1366_v21, 0.0 }
 0xde1   :  { %v1369_v3 = vsel %vm356_vm10, %v1365_v19, 0.0  ;;  %3392 = vmatprep.subr.bf16.mxu0 %v3391_v35 }
 0xde2   :  { %1370 = vadd.xlane.f32.xlu1 %v1369_v3  ;;  %3394 = vmatpush1.bf16.msra.mxu0 %v3393_v38  ;;  %v2744_v3 = vld [vmem:[%s4507_s3 + $0xe] ss:$0 sm:$0xff] }
 0xde3   :  { %3396 = vmatprep.subr.bf16.mxu0 %v3395_v41 }
 0xde6   :  { %1373 = vadd.xlane.f32.xlu1 %v1372_v22  ;;  %3398 = vmatpush1.bf16.msra.mxu0 %v3397_v44 }
 0xde7   :  { %3400 = vmatprep.subr.bf16.mxu0 %v3399_v47 }
 0xdea   :  { %3402 = vmatpush1.bf16.msra.mxu0 %v3401_v52 }
 0xdeb   :  { %3404 = vmatprep.subr.bf16.mxu0 %v3403_v55 }
 0xdee   :  { %3406 = vmatpush1.bf16.msra.mxu0 %v3405_v48 }
 0xe6f   :  { %v1371_v0 = vpop.xlane.xlu1 %1370 }
 0xe70   :  { %v1375_v24 = vmul.f32 0.015625, %v1371_v0 }
 0xe72   :  { %v1377_v25 = vsub.f32 %v1365_v19, %v1375_v24 }
 0xe73   :  { %v1374_v26 = vpop.xlane.xlu1 %1373 }
 0xe74   :  { %v1376_v27 = vmul.f32 0.015625, %v1374_v26  ;;  %v1379_v30 = vmul.f32 %v1377_v25, %v1377_v25 }
 0xe76   :  { %v1378_v31 = vsub.f32 %v1366_v21, %v1376_v27  ;;  %v1381_v32 = vsel %vm356_vm10, %v1379_v30, 0.0 }
 0xe77   :  { %1382 = vadd.xlane.f32.xlu0 %v1381_v32 }
 0xe78   :  { %v1380_v33 = vmul.f32 %v1378_v31, %v1378_v31 }
 0xe7a   :  { %v1384_v63 = vsel %vm356_vm10, %v1380_v33, 0.0 }
 0xe7b   :  { %1385 = vadd.xlane.f32.xlu1 %v1384_v63 }
 0xe8c   :  { %1520 = vrot.lane.b32.xlu1 %v2743_v51, %s3707_s17 }
 0xf04   :  { %v1383_v58 = vpop.xlane.xlu0 %1382 }
 0xf05   :  { %v1387_v59 = vmul.f32 0.015625, %v1383_v58 }
 0xf07   :  { %v1389_v60 = vadd.f32 1e-05, %v1387_v59 }
 0xf08   :  { %v1386_v61 = vpop.xlane.xlu1 %1385 }
 0xf09   :  { %3618 = vrsqrt.f32 %v1389_v60  ;;  %v1388_v62 = vmul.f32 0.015625, %v1386_v61 }
 0xf0b   :  { %v1390_v1 = vadd.f32 1e-05, %v1388_v62 }
 0xf0c   :  { %v1521_v19 = vpop.permute.xlu1 %1520 }
 0xf0d   :  { %3620 = vrsqrt.f32 %v1390_v1 }
 0xf13   :  { %v3619_v4 = vpop.eup %3618 }
 0xf14   :  { %v1393_v6 = vmul.f32 %v3619_v4, %v1377_v25 }
 0xf16   :  { %v1399_v9 = vmul.f32 %v2722_v5, %v1393_v6 }
 0xf17   :  { %v3621_v10 = vpop.eup %3620 }
 0xf18   :  { %v4217_v11 = vadd.f32 %v2723_v7, %v1399_v9  ;;  %v1394_v12 = vmul.f32 %v3621_v10, %v1378_v31 }
 0xf1a   :  { %2740 = vmatmul.mubr.msk.f32.vlgmr.msra.gmra.mrb[14].mxu0 %vm356_vm10, %v4217_v11  ;;  %v1400_v13 = vmul.f32 %v2722_v5, %v1394_v12 }
 0xf1b   :  { %1500 = vmatprep.mubr.f32.mxu0 %v3706_v23 }
 0xf1c   :  { %v4222_v14 = vadd.f32 %v2723_v7, %v1400_v13 }
 0xf1e   :  { %2741 = vmatmul.mubr.msk.f32.gmra.mrb[16].mxu0 %vm356_vm10, %v4222_v14 }
 0xfed   :  { %v1496_v16 = vpop.f32.mrb[14].mxu0 }
 0xfee   :  { %v1512_v17 = vadd.f32 %v2742_v15, %v1496_v16  ;;  %v1498_v28 = vpop.f32.mrb[15].mxu0  ;;  %v1523_v22 = vadd.f32 %v1521_v19, %v1496_v16 }
 0xfef   :  { %v4233_v26 = vadd.f32 %v2744_v3, %v1498_v28 }
 0xff0   :  { %3117 = vmatprep.mubr.msk.f32.mxu0 %vm183_vm4, %v1512_v17 }
 0xff1   :  { %v1502_v21 = vpop.f32.mrb[16].mxu0 }
 0xff2   :  { %v1513_v0 = vadd.f32 %v2742_v15, %v1502_v21  ;;  %v1524_v24 = vadd.f32 %v1521_v19, %v1502_v21  ;;  %v1504_v25 = vpop.f32.mrb[17].mxu0 }
 0xff3   :  { %v4235_v27 = vadd.f32 %v2744_v3, %v1504_v25 }
 0xff4   :  { %v3560_v30 = vpack.i.bf16 %v1524_v24, %v1523_v22 }
 0xff5   :  { %v3565_v31 = vpack.i.bf16 %v4235_v27, %v4233_v26  ;;  %v3413_v32 = vpack.c.bf16 %v4235_v27, %v4233_v26  ;;  %v2751_v27 = vld [vmem:[%s4510_s6 + $0x70] sm:$0xff] }
 0xff6   :  { %3556 = vrot.lane.b32.xlu1 %v3560_v30, %s3707_s17 }
0x1068   :  { %v3557_v33 = vpop.permute.xlu1 %3556 }
0x1069   :  { %v3559_v63 = vunpack.i.h.bf16 %v3557_v33  ;;  %v3558_v2 = vunpack.i.l.bf16 %v3557_v33  ;;  %v2749_v33 = vld [vmem:[%s4510_s6 + $0x60] sm:$0xff] }
0x106b   :  { %v3407_v34 = vpack.c.bf16 %v3559_v63, %v3558_v2  ;;  %v2750_v63 = vld [vmem:[%s4510_s6 + $0x68] sm:$0xff] }
0x106d   :  { %3409 = vmatprep.subr.msk.bf16.mxu0 %vm3961_vm11, %v3407_v34 }
0x106e   :  { %3412 = vmatpush3.bf16.xpose.msk.msra.mxu0 %vm3961_vm11, %v3407_v34 }
0x106f   :  { %3414 = vmatprep.subr.bf16.mxu0 %v3413_v32 }
0x1075   :  { %3118 = vmatmul.mubr.msk.f32.vlgmr.msra.gmra.mrb[18].mxu0 %vm183_vm4, %v1513_v0 }
0x1076   :  { %3416 = vmatpush3.bf16.msra.mxu0 %v3413_v32 }
0x1148   :  { %v3119_v35 = vpop.f32.mrb[18].mxu0 }
0x1149   :  { %v1633_v36 = vmul.f32 0.17677669, %v3119_v35  ;;  %v1623_v37 = vpop.f32.mrb[19].mxu0 }
0x114a   :  { %v1632_v38 = vmul.f32 0.17677669, %v1623_v37 }
0x114b   :  { %v1635_v39 = vadd.f32 %v1633_v36, %v3982_v18  ;;  %v3427_v36 = vpack.c.bf16 %v2750_v63, %v2749_v33 }
0x114c   :  { %v1634_v40 = vadd.f32 %v1632_v38, %v3984_v20 }
0x114d   :  { %v1639_v41 = vsel %vm52_vm2, %v1635_v39, -inf }
0x114e   :  { %1640 = vmax.xlane.f32.xlu0 %v1639_v41  ;;  %v1636_v42 = vsel %vm52_vm2, %v1634_v40, -inf  ;;  %v2745_v41 = vld [vmem:[%s4510_s6 + $0x40] sm:$0xff] }
0x114f   :  { %1637 = vmax.xlane.f32.xlu1 %v1636_v42  ;;  %v2746_v42 = vld [vmem:[%s4510_s6 + $0x48] sm:$0xff] }
0x1160   :  { %1739 = vrot.lane.b32.xlu1 %v1512_v17, %s3710_s2 }
0x11db   :  { %v1641_v43 = vpop.xlane.xlu0 %1640 }
0x11dc   :  { %v1643_v44 = vsub.f32 %v1635_v39, %v1641_v43  ;;  %v1638_v45 = vpop.xlane.xlu1 %1637  ;;  %v3435_v43 = vpack.c.bf16 %v2746_v42, %v2745_v41  ;;  %v2788_v41 = vld [vmem:[%s4512_s8 + $0xa8] sm:$0xff] }
0x11dd   :  { %v1642_v46 = vsub.f32 %v1634_v40, %v1638_v45  ;;  %v2748_v45 = vld [vmem:[%s4510_s6 + $0x58] sm:$0xff] }
0x11de   :  { %v1646_v47 = vmul.f32 1.442695, %v1643_v44  ;;  %v2747_v44 = vld [vmem:[%s4510_s6 + $0x50] sm:$0xff] }
0x11df   :  { %v1644_v49 = vmul.f32 1.442695, %v1642_v46 }
0x11e0   :  { %3622 = vpow2.f32 %v1646_v47  ;;  %v1740_v1 = vpop.permute.xlu1 %1739 }
0x11e1   :  { %3624 = vpow2.f32 %v1644_v49  ;;  %v3439_v49 = vpack.c.bf16 %v2748_v45, %v2747_v44  ;;  %v2790_v44 = vld [vmem:[%s4512_s8 + $0xb8] sm:$0xff] }
0x11ea   :  { %v3623_v50 = vpop.eup %3622 }
0x11eb   :  { %v1651_v52 = vsel %vm52_vm2, %v3623_v50, 0.0  ;;  %v3625_v53 = vpop.eup %3624 }
0x11ec   :  { %1652 = vadd.xlane.f32.xlu0 %v1651_v52  ;;  %v1648_v54 = vsel %vm52_vm2, %v3625_v53, 0.0 }
0x11f0   :  { %1649 = vadd.xlane.f32.xlu0 %v1648_v54 }
0x1206   :  { %3561 = vrot.lane.b32.xlu0 %v3560_v30, %s3709_s1 }
0x120a   :  { %1741 = vrot.lane.b32.xlu0 %v1513_v0, %s3710_s2 }
0x1279   :  { %v1653_v55 = vpop.xlane.xlu0 %1652 }
0x127a   :  { %3626 = vrcp.f32 %v1653_v55 }
0x127d   :  { %v1650_v56 = vpop.xlane.xlu0 %1649 }
0x127e   :  { %3628 = vrcp.f32 %v1650_v56 }
0x1281   :  { %v3562_v57 = vpop.permute.xlu0 %3561 }
0x1282   :  { %v3564_v48 = vunpack.i.h.bf16 %v3562_v57  ;;  %v3563_v51 = vunpack.i.l.bf16 %v3562_v57 }
0x1284   :  { %v3417_v58 = vpack.c.bf16 %v3564_v48, %v3563_v51  ;;  %v3627_v59 = vpop.eup %3626 }
0x1285   :  { %v1657_v62 = vmul.f32 %v3627_v59, %v3623_v50  ;;  %v1742_v4 = vpop.permute.xlu0 %1741  ;;  %v2769_v50 = vld [vmem:[%s4507_s3 + $0xf] ss:$0 sm:$0xff] }
0x1286   :  { %3419 = vmatprep.subr.msk.bf16.mxu0 %vm3961_vm11, %v3417_v58 }
0x1288   :  { %v3629_v60 = vpop.eup %3628 }
0x1289   :  { %v1656_v61 = vmul.f32 %v3629_v60, %v3625_v53 }
0x128b   :  { %3124 = vmatprep.mubr.msk.f32.mxu0 %vm52_vm2, %v1656_v61 }
0x128c   :  { %3125 = vmatmul.mubr.msk.f32.vlgmr.msra.gmra.mrb[20].mxu0 %vm52_vm2, %v1657_v62 }
0x128d   :  { %3422 = vmatpush3.bf16.xpose.msk.msra.mxu0 %vm3961_vm11, %v3417_v58  ;;  %3131 = vmatprep.mubr.msk.f32.mxu0 %vm183_vm4, %v1740_v1 }
0x1294   :  { %3132 = vmatmul.mubr.msk.f32.vlgmr.msra.gmra.mrb[22].mxu0 %vm183_vm4, %v1742_v4 }
0x135f   :  { %v4264_v5 = vpop.f32.mrb[20].mxu0 }
0x1360   :  { %v4266_v6 = vpop.f32.mrb[21].mxu0 }
0x1367   :  { %v3133_v7 = vpop.f32.mrb[22].mxu0 }
0x1368   :  { %v1831_v9 = vmul.f32 0.17677669, %v3133_v7  ;;  %v1821_v10 = vpop.f32.mrb[23].mxu0  ;;  %v2773_v7 = vld [vmem:[%s4511_s7 + $0x48] sm:$0xff] }
0x1369   :  { %v1830_v12 = vmul.f32 0.17677669, %v1821_v10  ;;  %v2774_v10 = vld [vmem:[%s4511_s7 + $0x50] sm:$0xff] }
0x136a   :  { %v1833_v13 = vadd.f32 %v1831_v9, %v3982_v18 }
0x136b   :  { %v1832_v15 = vadd.f32 %v1830_v12, %v3984_v20  ;;  %v2775_v12 = vld [vmem:[%s4511_s7 + $0x58] sm:$0xff] }
0x136c   :  { %v1837_v8 = vsel %vm52_vm2, %v1833_v13, -inf }
0x136d   :  { %1838 = vmax.xlane.f32.xlu1 %v1837_v8  ;;  %v1834_v16 = vsel %vm52_vm2, %v1832_v15, -inf  ;;  %v2777_v8 = vld [vmem:[%s4511_s7 + $0x68] sm:$0xff] }
0x136e   :  { %1835 = vmax.xlane.f32.xlu0 %v1834_v16 }
0x13fa   :  { %v1839_v17 = vpop.xlane.xlu1 %1838 }
0x13fb   :  { %v1841_v28 = vsub.f32 %v1833_v13, %v1839_v17  ;;  %v1836_v19 = vpop.xlane.xlu0 %1835  ;;  %v3447_v13 = vpack.c.bf16 %v2775_v12, %v2774_v10  ;;  %v2778_v17 = vld [vmem:[%s4511_s7 + $0x70] sm:$0xff] }
0x13fc   :  { %v1840_v3 = vsub.f32 %v1832_v15, %v1836_v19  ;;  %v2776_v15 = vld [vmem:[%s4511_s7 + $0x60] sm:$0xff] }
0x13fd   :  { %v1844_v21 = vmul.f32 1.442695, %v1841_v28  ;;  %v3451_v16 = vpack.c.bf16 %v2777_v8, %v2776_v15  ;;  %v2779_v28 = vld [vmem:[%s4511_s7 + $0x78] sm:$0xff] }
0x13fe   :  { %v1842_v22 = vmul.f32 1.442695, %v1840_v3  ;;  %v3455_v19 = vpack.c.bf16 %v2779_v28, %v2778_v17 }
0x13ff   :  { %3630 = vpow2.f32 %v1844_v21 }
0x1400   :  { %3632 = vpow2.f32 %v1842_v22 }
0x1409   :  { %v3631_v0 = vpop.eup %3630 }
0x140a   :  { %v1849_v24 = vsel %vm52_vm2, %v3631_v0, 0.0  ;;  %v3633_v18 = vpop.eup %3632 }
0x140b   :  { %1850 = vadd.xlane.f32.xlu0 %v1849_v24  ;;  %v1846_v20 = vsel %vm52_vm2, %v3633_v18, 0.0 }
0x140f   :  { %1847 = vadd.xlane.f32.xlu0 %v1846_v20 }
0x1425   :  { %3566 = vrot.lane.b32.xlu0 %v3565_v31, %s3710_s2  ;;  %v2752_v31 = vld [vmem:[%s4510_s6 + $0x78] sm:$0xff] }
0x1426   :  { %v3431_v40 = vpack.c.bf16 %v2752_v31, %v2751_v27  ;;  %v2784_v27 = vld [vmem:[%s4512_s8 + $0x88] sm:$0xff] }
0x1498   :  { %v1851_v25 = vpop.xlane.xlu0 %1850 }
0x1499   :  { %3634 = vrcp.f32 %v1851_v25  ;;  %v2770_v25 = vld [vmem:[%s4507_s3 + $0x10] ss:$0 sm:$0xff] }
0x149c   :  { %v1848_v30 = vpop.xlane.xlu0 %1847 }
0x149d   :  { %3636 = vrcp.f32 %v1848_v30 }
0x14a0   :  { %v3567_v32 = vpop.permute.xlu0 %3566 }
0x14a1   :  { %v3569_v2 = vunpack.i.h.bf16 %v3567_v32  ;;  %v3568_v34 = vunpack.i.l.bf16 %v3567_v32  ;;  %v2771_v32 = vld [vmem:[%s4507_s3 + $0x11] ss:$0 sm:$0xff] }
0x14a3   :  { %v3423_v35 = vpack.c.bf16 %v3569_v2, %v3568_v34  ;;  %v3635_v26 = vpop.eup %3634 }
0x14a4   :  { %v1855_v39 = vmul.f32 %v3635_v26, %v3631_v0  ;;  %v2783_v26 = vld [vmem:[%s4512_s8 + $0x80] sm:$0xff] }
0x14a5   :  { %3424 = vmatprep.subr.bf16.mxu1 %v3423_v35  ;;  %v3459_v31 = vpack.c.bf16 %v2784_v27, %v2783_v26 }
0x14a6   :  { %3426 = vmatpush3.bf16.msra.mxu1 %v3423_v35 }
0x14a7   :  { %v3637_v37 = vpop.eup %3636  ;;  %3428 = vmatprep.subr.bf16.mxu1 %v3427_v36 }
0x14a8   :  { %v1854_v38 = vmul.f32 %v3637_v37, %v3633_v18  ;;  %v2785_v37 = vld [vmem:[%s4512_s8 + $0x90] sm:$0xff] }
0x14aa   :  { %3138 = vmatprep.mubr.msk.f32.mxu1 %vm52_vm2, %v1854_v38  ;;  %v2786_v38 = vld [vmem:[%s4512_s8 + $0x98] sm:$0xff] }
0x14ab   :  { %3139 = vmatmul.mubr.msk.f32.vlgmr.msra.gmra.mrb[8].mxu1 %vm52_vm2, %v1855_v39  ;;  %v3463_v39 = vpack.c.bf16 %v2786_v38, %v2785_v37  ;;  %vm3712_vm2 = vmmov 0  }
0x14ac   :  { %3430 = vmatpush3.bf16.msra.mxu1 %v3427_v36 }
0x14ad   :  { %3432 = vmatprep.subr.bf16.mxu1 %v3431_v40 }
0x14b0   :  { %3434 = vmatpush3.bf16.msra.mxu1 %v3431_v40  ;;  %v2787_v40 = vld [vmem:[%s4512_s8 + $0xa0] sm:$0xff] }
0x14b1   :  { %3436 = vmatprep.subr.bf16.mxu1 %v3435_v43  ;;  %v3467_v42 = vpack.c.bf16 %v2788_v41, %v2787_v40  ;;  %v3711_v41 = vmov 0.0|0.0  }
0x157e   :  { %v3140_v46 = vpop.f32.mrb[8].mxu1 }
0x157f   :  { %v1936_v47 = vpop.f32.mrb[9].mxu1 }
0x1580   :  { %3149 = vmatprep.mubr.msk.f32.mxu1 %vm183_vm4, %v1936_v47  ;;  %v2792_v47 = vld [vmem:[%s4512_s8 + $0xc8] sm:$0xff] }
0x1581   :  { %3150 = vmatmul.mubr.msk.f32.vlgmr.msra.gmra.mrb[10].mxu1 %vm183_vm4, %v3140_v46  ;;  %v2791_v46 = vld [vmem:[%s4512_s8 + $0xc0] sm:$0xff] }
0x1582   :  { %3438 = vmatpush3.bf16.msra.mxu1 %v3435_v43  ;;  %3160 = vmatprep.mubr.msk.f32.mxu1 %vm183_vm4, %v4266_v6  ;;  %v2789_v43 = vld [vmem:[%s4512_s8 + $0xb0] sm:$0xff] }
0x1583   :  { %3440 = vmatprep.subr.bf16.mxu1 %v3439_v49  ;;  %v3471_v45 = vpack.c.bf16 %v2790_v44, %v2789_v43  ;;  %v2416_v43 = vld [vmem:[%s4513_s9 + $0x18] sm:$0xff] }
0x1586   :  { %3442 = vmatpush3.bf16.msra.mxu1 %v3439_v49  ;;  %v2793_v49 = vld [vmem:[%s4512_s8 + $0xd0] sm:$0xff] }
0x1587   :  { %3460 = vmatprep.subr.bf16.mxu1 %v3459_v31 }
0x1589   :  { %3161 = vmatmul.mubr.msk.f32.vlgmr.msra.gmra.mrb[10].mxu1 %vm183_vm4, %v4264_v5  ;;  %vm2616_vm4 = vcmask 9216  }
0x158a   :  { %3462 = vmatpush3.bf16.msra.mxu1 %v3459_v31 }
0x158b   :  { %3464 = vmatprep.subr.bf16.mxu1 %v3463_v39 }
0x158e   :  { %3466 = vmatpush3.bf16.msra.mxu1 %v3463_v39  ;;  %v2414_v39 = vld [vmem:[%s4513_s9 + $0x8] sm:$0xff] }
0x158f   :  { %3468 = vmatprep.subr.bf16.mxu1 %v3467_v42 }
0x1592   :  { %3470 = vmatpush3.bf16.msra.mxu1 %v3467_v42  ;;  %v2415_v42 = vld [vmem:[%s4513_s9 + $0x10] sm:$0xff] }
0x1593   :  { %3472 = vmatprep.subr.bf16.mxu1 %v3471_v45  ;;  %v3495_v44 = vpack.c.bf16 %v2416_v43, %v2415_v42 }
0x1596   :  { %3474 = vmatpush3.bf16.msra.mxu1 %v3471_v45  ;;  %v2417_v45 = vld [vmem:[%s4513_s9 + $0x20] sm:$0xff] }
0x165c   :  { %v3162_v52 = vpop.f32.mrb[10].mxu1 }
0x165d   :  { %v2098_v53 = vpop.f32.mrb[11].mxu1  ;;  %v2113_v54 = vadd.f32 %v3162_v52, %v2769_v50  ;;  %v2794_v52 = vld [vmem:[%s4512_s8 + $0xd8] sm:$0xff] }
0x165e   :  { %v2112_v55 = vadd.f32 %v2769_v50, %v2098_v53  ;;  %v3475_v50 = vpack.c.bf16 %v2792_v47, %v2791_v46  ;;  %v3479_v53 = vpack.c.bf16 %v2794_v52, %v2793_v49  ;;  %v2418_v46 = vld [vmem:[%s4513_s9 + $0x28] sm:$0xff]  ;;  %v2419_v49 = vld [vmem:[%s4513_s9 + $0x30] sm:$0xff] }
0x165f   :  { %v2115_v48 = vadd.f32 %v2113_v54, %v4222_v14  ;;  %v2772_v14 = vld [vmem:[%s4511_s7 + $0x40] sm:$0xff]  ;;  %v3498_v47 = vpack.c.bf16 %v2418_v46, %v2417_v45 }
0x1660   :  { %v2114_v56 = vadd.f32 %v2112_v55, %v4217_v11  ;;  %v3443_v9 = vpack.c.bf16 %v2773_v7, %v2772_v14  ;;  %v2795_v54 = vld [vmem:[%s4512_s8 + $0xe0] sm:$0xff]  ;;  %v2796_v55 = vld [vmem:[%s4512_s8 + $0xe8] sm:$0xff]  ;;  %3476 = vmatprep.subr.bf16.mxu1 %v3475_v50 }
0x1661   :  { %v2121_v51 = vsel %vm356_vm10, %v2115_v48, 0.0  ;;  %3478 = vmatpush3.bf16.msra.mxu1 %v3475_v50  ;;  %v2420_v50 = vld [vmem:[%s4513_s9 + $0x38] sm:$0xff] }
0x1662   :  { %v2118_v57 = vsel %vm356_vm10, %v2114_v56, 0.0  ;;  %3444 = vmatprep.subr.bf16.mxu0 %v3443_v9  ;;  %3480 = vmatprep.subr.bf16.mxu1 %v3479_v53  ;;  %v3501_v52 = vpack.c.bf16 %v2420_v50, %v2419_v49 }
0x1663   :  { %2119 = vadd.xlane.f32.xlu1 %v2118_v57  ;;  %3446 = vmatpush3.bf16.msra.mxu0 %v3443_v9  ;;  %v2797_v57 = vld [vmem:[%s4512_s8 + $0xf0] sm:$0xff] }
0x1664   :  { %3448 = vmatprep.subr.bf16.mxu0 %v3447_v13 }
0x1665   :  { %3482 = vmatpush3.bf16.msra.mxu1 %v3479_v53 }
0x1667   :  { %2122 = vadd.xlane.f32.xlu1 %v2121_v51  ;;  %3450 = vmatpush3.bf16.msra.mxu0 %v3447_v13 }
0x1668   :  { %3452 = vmatprep.subr.bf16.mxu0 %v3451_v16 }
0x166b   :  { %3454 = vmatpush3.bf16.msra.mxu0 %v3451_v16 }
0x166c   :  { %3456 = vmatprep.subr.bf16.mxu0 %v3455_v19 }
0x166f   :  { %3458 = vmatpush3.bf16.msra.mxu0 %v3455_v19 }
0x1670   :  { %3491 = vmatprep.subr.bf16.mxu0 %v3711_v41 }
0x16f0   :  { %v2120_v58 = vpop.xlane.xlu1 %2119 }
0x16f1   :  { %v2124_v59 = vmul.f32 0.015625, %v2120_v58  ;;  %v2780_v58 = vld [vmem:[%s4507_s3 + $0x12] ss:$0 sm:$0xff] }
0x16f3   :  { %v2126_v60 = vsub.f32 %v2114_v56, %v2124_v59  ;;  %v3483_v56 = vpack.c.bf16 %v2796_v55, %v2795_v54  ;;  %v3575_v54 = vpack.i.bf16 %v2416_v43, %v2415_v42  ;;  %v3580_v55 = vpack.i.bf16 %v2418_v46, %v2417_v45 }
0x16f4   :  { %v2123_v61 = vpop.xlane.xlu1 %2122 }
0x16f5   :  { %v2125_v62 = vmul.f32 0.015625, %v2123_v61  ;;  %v2128_v1 = vmul.f32 %v2126_v60, %v2126_v60  ;;  %3484 = vmatprep.subr.bf16.mxu1 %v3483_v56 }
0x16f6   :  { %3486 = vmatpush3.bf16.msra.mxu1 %v3483_v56  ;;  %v3585_v56 = vpack.i.bf16 %v2420_v50, %v2419_v49 }
0x16f7   :  { %v2127_v4 = vsub.f32 %v2115_v48, %v2125_v62  ;;  %v2130_v5 = vsel %vm356_vm10, %v2128_v1, 0.0  ;;  %v2798_v48 = vld [vmem:[%s4512_s8 + $0xf8] sm:$0xff] }
0x16f8   :  { %2131 = vadd.xlane.f32.xlu1 %v2130_v5  ;;  %v3487_v51 = vpack.c.bf16 %v2798_v48, %v2797_v57 }
0x16f9   :  { %v2129_v6 = vmul.f32 %v2127_v4, %v2127_v4 }
0x16fa   :  { %3488 = vmatprep.subr.bf16.mxu1 %v3487_v51 }
0x16fb   :  { %v2133_v11 = vsel %vm356_vm10, %v2129_v6, 0.0  ;;  %3490 = vmatpush3.bf16.msra.mxu1 %v3487_v51 }
0x16fc   :  { %2134 = vadd.xlane.f32.xlu1 %v2133_v11 }
0x1785   :  { %v2132_v3 = vpop.xlane.xlu1 %2131 }
0x1786   :  { %v2136_v21 = vmul.f32 0.015625, %v2132_v3 }
0x1788   :  { %v2138_v22 = vadd.f32 1e-05, %v2136_v21  ;;  %v2799_v21 = vld [vmem:[%s4507_s3 + $0x13] ss:$0 sm:$0xff] }
0x1789   :  { %v2135_v0 = vpop.xlane.xlu1 %2134 }
0x178a   :  { %3638 = vrsqrt.f32 %v2138_v22  ;;  %v2137_v24 = vmul.f32 0.015625, %v2135_v0 }
0x178c   :  { %v2139_v18 = vadd.f32 1e-05, %v2137_v24 }
0x178e   :  { %3640 = vrsqrt.f32 %v2139_v18 }
0x1794   :  { %v3639_v20 = vpop.eup %3638 }
0x1795   :  { %v2142_v30 = vmul.f32 %v3639_v20, %v2126_v60 }
0x1797   :  { %v2148_v33 = vmul.f32 %v2770_v25, %v2142_v30 }
0x1798   :  { %v3641_v63 = vpop.eup %3640 }
0x1799   :  { %v2143_v2 = vmul.f32 %v3641_v63, %v2127_v4  ;;  %v4349_v34 = vadd.f32 %v2771_v32, %v2148_v33 }
0x179b   :  { %v2149_v35 = vmul.f32 %v2770_v25, %v2143_v2  ;;  %3179 = vmatprep.mubr.msk.f32.mxu0 %vm356_vm10, %v4349_v34 }
0x179d   :  { %v4353_v36 = vadd.f32 %v2771_v32, %v2149_v35 }
0x179f   :  { %3180 = vmatmul.mubr.msk.f32.vlgmr.msra.gmra.mrb[24].mxu0 %vm356_vm10, %v4353_v36 }
0x17a0   :  { %3233 = vmatprep.mubr.msk.f32.mxu0 %vm3712_vm2, %v3706_v23 }
0x1872   :  { %v3181_v59 = vpop.f32.mrb[24].mxu0 }
0x1873   :  { %v2248_v60 = vadd.f32 %v3181_v59, %v2780_v58  ;;  %v2242_v61 = vpop.f32.mrb[25].mxu0 }
0x1874   :  { %v2243_v62 = vadd.f32 %v2780_v58, %v2242_v61 }
0x1875   :  { %v2252_v1 = vmul.f32 %v2248_v60, %v2248_v60 }
0x1876   :  { %v2251_v4 = vmul.f32 %v2243_v62, %v2243_v62 }
0x1877   :  { %v2254_v5 = vmul.f32 %v2252_v1, %v2248_v60 }
0x1878   :  { %v2253_v6 = vmul.f32 %v2251_v4, %v2243_v62  ;;  %v2801_v4 = vld [vmem:[%s4507_s3 + $0x15] ss:$0 sm:$0xff] }
0x1879   :  { %v2256_v11 = vmul.f32 0.044715, %v2254_v5 }
0x187a   :  { %v2255_v14 = vmul.f32 0.044715, %v2253_v6 }
0x187b   :  { %v2258_v7 = vadd.f32 %v2256_v11, %v2248_v60 }
0x187c   :  { %v2257_v9 = vadd.f32 %v2255_v14, %v2243_v62 }
0x187d   :  { %v2260_v10 = vmul.f32 0.7978846, %v2258_v7 }
0x187e   :  { %v2259_v12 = vmul.f32 0.7978846, %v2257_v9 }
0x187f   :  { %3642 = vtanh.f32 %v2260_v10 }
0x1880   :  { %3644 = vtanh.f32 %v2259_v12 }
0x1889   :  { %v3643_v13 = vpop.eup %3642 }
0x188a   :  { %v3645_v15 = vpop.eup %3644  ;;  %v2264_v8 = vadd.f32 1.0, %v3643_v13 }
0x188b   :  { %v2263_v16 = vadd.f32 1.0, %v3645_v15 }
0x188c   :  { %v2266_v17 = vmul.f32 0.5, %v2264_v8 }
0x188d   :  { %v2265_v28 = vmul.f32 0.5, %v2263_v16 }
0x188e   :  { %v2268_v3 = vmul.f32 %v2266_v17, %v2248_v60 }
0x188f   :  { %v2267_v19 = vmul.f32 %v2265_v28, %v2243_v62  ;;  %v2800_v62 = vld [vmem:[%s4507_s3 + $0x14] ss:$0 sm:$0xff] }
0x1891   :  { %3214 = vmatprep.mubr.f32.mxu1 %v2267_v19 }
0x1892   :  { %3215 = vmatmul.mubr.f32.vlgmr.msra.gmra.mrb[12].mxu1 %v2268_v3 }
0x1965   :  { %v3216_v22 = vpop.f32.mrb[12].mxu1 }
0x1966   :  { %v2363_v0 = vadd.f32 %v3216_v22, %v2799_v21  ;;  %v2357_v24 = vpop.f32.mrb[13].mxu1 }
0x1967   :  { %v2358_v18 = vadd.f32 %v2799_v21, %v2357_v24 }
0x1968   :  { %v2367_v20 = vadd.f32 %v2363_v0, %v4353_v36 }
0x1969   :  { %v2366_v25 = vadd.f32 %v2358_v18, %v4349_v34  ;;  %v2413_v34 = vld [vmem:[%s4513_s9] sm:$0xff] }
0x196a   :  { %v2373_v30 = vsel %vm356_vm10, %v2367_v20, 0.0  ;;  %v3492_v40 = vpack.c.bf16 %v2414_v39, %v2413_v34  ;;  %v3570_v53 = vpack.i.bf16 %v2414_v39, %v2413_v34 }
0x196b   :  { %2374 = vadd.xlane.f32.xlu0 %v2373_v30  ;;  %v2370_v32 = vsel %vm356_vm10, %v2366_v25, 0.0 }
0x196c   :  { %2371 = vadd.xlane.f32.xlu1 %v2370_v32  ;;  %3493 = vmatpush3.bf16.msra.mxu0 %v3492_v40  ;;  %v2802_v32 = vld [vmem:[%s4507_s3 + $0x16] ss:$0 sm:$0xff] }
0x196d   :  { %3494 = vmatprep.subr.bf16.mxu0 %v3711_v41 }
0x1970   :  { %3496 = vmatpush3.bf16.msra.mxu0 %v3495_v44 }
0x1971   :  { %3497 = vmatprep.subr.bf16.mxu0 %v3711_v41 }
0x1974   :  { %3499 = vmatpush3.bf16.msra.mxu0 %v3498_v47 }
0x1975   :  { %3500 = vmatprep.subr.bf16.mxu0 %v3711_v41 }
0x1978   :  { %3502 = vmatpush3.bf16.msra.mxu0 %v3501_v52 }
0x1979   :  { %3503 = vmatprep.subr.bf16.mxu0 %v3711_v41 }
0x1981   :  { %3576 = vrot.lane.b32.xlu0 %v3575_v54, %s3707_s17 }
0x19f8   :  { %v2375_v33 = vpop.xlane.xlu0 %2374 }
0x19f9   :  { %v2377_v63 = vmul.f32 0.015625, %v2375_v33  ;;  %v2372_v2 = vpop.xlane.xlu1 %2371 }
0x19fa   :  { %v2376_v35 = vmul.f32 0.015625, %v2372_v2 }
0x19fb   :  { %v2379_v26 = vsub.f32 %v2367_v20, %v2377_v63 }
0x19fc   :  { %v2378_v27 = vsub.f32 %v2366_v25, %v2376_v35  ;;  %v3577_v12 = vpop.permute.xlu0 %3576 }
0x19fd   :  { %v2381_v31 = vmul.f32 %v2379_v26, %v2379_v26  ;;  %v3579_v15 = vunpack.i.h.bf16 %v3577_v12  ;;  %v3578_v28 = vunpack.i.l.bf16 %v3577_v12 }
0x19fe   :  { %v2380_v38 = vmul.f32 %v2378_v27, %v2378_v27 }
0x19ff   :  { %v2385_v37 = vsel %vm356_vm10, %v2381_v31, 0.0  ;;  %v3507_v3 = vpack.c.bf16 %v3579_v15, %v3578_v28 }
0x1a00   :  { %2386 = vadd.xlane.f32.xlu1 %v2385_v37  ;;  %v2382_v36 = vsel %vm356_vm10, %v2380_v38, 0.0 }
0x1a04   :  { %2383 = vadd.xlane.f32.xlu1 %v2382_v36  ;;  %v41_v36 = vld [vmem:[%s4504_s0 + $0x10] sm:$0xff]  ;;  %s3713_s0 = smov [#allocation2]  }
0x1a15   :  { %3571 = vrot.lane.b32.xlu1 %v3570_v53, %s3707_s17 }
0x1a19   :  { %3581 = vrot.lane.b32.xlu1 %v3580_v55, %s3707_s17 }
0x1a1d   :  { %3586 = vrot.lane.b32.xlu1 %v3585_v56, %s3707_s17 }
0x1a8d   :  { %v2387_v57 = vpop.xlane.xlu1 %2386 }
0x1a8e   :  { %v2389_v48 = vmul.f32 0.015625, %v2387_v57 }
0x1a90   :  { %v2391_v51 = vadd.f32 1e-05, %v2389_v48 }
0x1a91   :  { %v2384_v58 = vpop.xlane.xlu1 %2383 }
0x1a92   :  { %3646 = vrsqrt.f32 %v2391_v51  ;;  %v2388_v59 = vmul.f32 0.015625, %v2384_v58 }
0x1a94   :  { %v2390_v60 = vadd.f32 1e-05, %v2388_v59 }
0x1a95   :  { %v3572_v5 = vpop.permute.xlu1 %3571 }
0x1a96   :  { %3648 = vrsqrt.f32 %v2390_v60  ;;  %v3574_v9 = vunpack.i.h.bf16 %v3572_v5  ;;  %v3573_v10 = vunpack.i.l.bf16 %v3572_v5 }
0x1a98   :  { %v3504_v17 = vpack.c.bf16 %v3574_v9, %v3573_v10 }
0x1a99   :  { %v3582_v21 = vpop.permute.xlu1 %3581 }
0x1a9a   :  { %v3584_v22 = vunpack.i.h.bf16 %v3582_v21  ;;  %v3583_v0 = vunpack.i.l.bf16 %v3582_v21 }
0x1a9c   :  { %v3647_v61 = vpop.eup %3646  ;;  %v3510_v24 = vpack.c.bf16 %v3584_v22, %v3583_v0 }
0x1a9d   :  { %v2395_v1 = vmul.f32 %v3647_v61, %v2379_v26  ;;  %v3587_v18 = vpop.permute.xlu1 %3586  ;;  %v2804_v26 = vld [vmem:[%s4507_s3 + $0x17] ss:$0 sm:$0xff]  ;;  %s2655_s3 = sshll.u32 %s3713_s0, 4  ;;  %s2656_s3 = int_to_ptr.vmem [resolvable:$true] %s2655_s3 }
0x1a9e   :  { %v3589_v20 = vunpack.i.h.bf16 %v3587_v18  ;;  %v3588_v25 = vunpack.i.l.bf16 %v3587_v18  ;;  %s3656_s13 = scalar_lea.vmem %s2656_s3, 32  ;;  %p3661_p1 = scmp.lt.s32.totalorder %s2656_s3, %s2656_s3 }
0x1a9f   :  { %v2401_v6 = vmul.f32 %v2800_v62, %v2395_v1  ;;  %p3657_p0 = scmp.ne.s32.totalorder %s2656_s3, %s3656_s13  ;;  %p3662_p2 = scmp.lt.s32.totalorder %s3656_s13, %s3656_s13 }
0x1aa0   :  { %v3649_v11 = vpop.eup %3648  ;;  %v3513_v30 = vpack.c.bf16 %v3589_v20, %v3588_v25 }
0x1aa1   :  { %v2394_v14 = vmul.f32 %v3649_v11, %v2378_v27  ;;  %v2407_v7 = vadd.f32 %v2801_v4, %v2401_v6  ;;  %p3663_p3 = por %p3662_p2, %p3661_p1 }
0x1aa3   :  { %v2400_v13 = vmul.f32 %v2800_v62, %v2394_v14  ;;  %v2409_v16 = vrot.slane %v2407_v7, 7  ;;  %p3664_p4 = pnand %p3663_p3, %p3657_p0 }
0x1aa5   :  { %v2406_v8 = vadd.f32 %v2801_v4, %v2400_v13 }
0x1aa7   :  { %v2412_v19 = vsel %vm2411_vm3, %v2406_v8, %v2409_v16 }
0x1aa8   :  { %3234 = vmatmul.mubr.msk.f32.vlgmr.msra.gmra.mrb[26].mxu0 %vm356_vm10, %v2412_v19 }
0x1aa9   :  { %3505 = vmatpush3.bf16.msra.mxu0 %v3504_v17  ;;  %3252 = vmatprep.mubr.msk.f32.mxu0 %vm3712_vm2, %v3706_v23 }
0x1aaa   :  { %3506 = vmatprep.subr.bf16.mxu0 %v3711_v41 }
0x1aad   :  { %3508 = vmatpush3.bf16.msra.mxu0 %v3507_v3 }
0x1aae   :  { %3509 = vmatprep.subr.bf16.mxu0 %v3711_v41 }
0x1ab1   :  { %3511 = vmatpush3.bf16.msra.mxu0 %v3510_v24 }
0x1ab2   :  { %3512 = vmatprep.subr.bf16.mxu0 %v3711_v41 }
0x1ab5   :  { %3514 = vmatpush3.bf16.msra.mxu0 %v3513_v30 }
0x1b7b   :  { %v2495_v33 = vpop.f32.mrb[26].mxu0 }
0x1b7c   :  { %v2496_v63 = vadd.f32 %v2802_v32, %v2495_v33  ;;  %v3235_v2 = vpop.f32.mrb[27].mxu0 }
0x1b7e   :  { %3650 = vtanh.f32 %v2496_v63 }
0x1b88   :  { %v3651_v35 = vpop.eup %3650 }
0x1b89   :  { %3253 = vmatmul.mubr.msk.f32.vlgmr.msra.gmra.mrb[28].mxu0 %vm356_vm10, %v3651_v35 }
0x1c5c   :  { %v2606_v27 = vpop.f32.mrb[28].mxu0 }
0x1c5d   :  { %v2607_v31 = vadd.f32 %v2804_v26, %v2606_v27  ;;  %v3254_v37 = vpop.f32.mrb[29].mxu0 }
0x1c5f   :  { %v2617_v38 = vsel %vm2616_vm4, %v2607_v31, -inf  ;;  %2645 = vst.msk [vmem:[#allocation2] sm:$0x3] %vm2616_vm4, %v2607_v31 }
0x1c60   :  { %2618 = vmax.xlane.f32.xlu1 %v2617_v38 }
0x1c71   :  { %2611 = vperm.xlu1 %3539, %v41_v36  }
0x1ced   :  { %v2619_v34 = vpop.xlane.xlu1 %2618 }
0x1cee   :  { %v2620_v39 = vsub.f32 %v2607_v31, %v2619_v34 }
0x1cf0   :  { %v2621_v40 = vmul.f32 1.442695, %v2620_v39 }
0x1cf1   :  { %v2612_v45 = vpop.permute.xlu1 %2611 }
0x1cf2   :  { %3652 = vpow2.f32 %v2621_v40  ;;  %vm2613_vm5 = vcmp.eq.s32.totalorder %v3817_v29, %v2612_v45 }
0x1cf3   :  { %v2806_v50 = vsel %vm2613_vm5, 1.0, %v3706_v23 }
0x1cfc   :  { %v3653_v41 = vpop.eup %3652 }
0x1cfd   :  { %v2623_v42 = vsel %vm2616_vm4, %v3653_v41, 0.0 }
0x1cfe   :  { %2624 = vadd.xlane.f32.xlu0 %v2623_v42 }
0x1d8b   :  { %v2625_v43 = vpop.xlane.xlu0 %2624 }
0x1d8c   :  { %3654 = vlog2.f32 %v2625_v43 }
0x1d96   :  { %v3655_v44 = vpop.eup %3654 }
0x1d97   :  { %v2627_v46 = vmul.f32 0.6931472, %v3655_v44 }
0x1d99   :  { %v2628_v47 = vadd.f32 %v2627_v46, %v2619_v34 }
0x1d9b   :  { %v2629_v49 = vsub.f32 %v2607_v31, %v2628_v47 }
0x1d9d   :  { %v2630_v52 = vmul.f32 %v2806_v50, %v2629_v49 }
0x1d9f   :  { %v2631_v53 = vsel %vm2616_vm4, %v2630_v52, 0.0 }
0x1da0   :  { %2632 = vadd.xlane.f32.xlu0 %v2631_v53 }
0x1da1   :  { %3667 = shalt.err (!%p3664_p4)
}
0x1da2   :  { %s3668_s2 = scalar_lea.hbm %s4514_s10, 32 }
0x1da3   :  { %p3669_p5 = scmp.ne.s32.totalorder %s4514_s10, %s3668_s2  ;;  %p3672_p6 = scmp.lt.u32.totalorder %s3668_s2, %s4514_s10 }
0x1da5   :  { %p3674_p7 = pnand %p3672_p6, %p3669_p5 }
0x1da7   :  { %3677 = shalt.err (!%p3674_p7)
}
0x1da8   :  { %2658 = dma.vmem_to_hbm [thread:$0]  %s2656_s3, 32, %s4514_s10, [#allocation3]   ;;  %vm2647_vm6 = vcmask 0  }
0x1da9   :  { %s3714_s24 = smov [#allocation4]  }
0x1daa   :  { %s2665_s25 = sshll.u32 %s3714_s24, 4  ;;  %s2666_s25 = int_to_ptr.vmem [resolvable:$true] %s2665_s25 }
0x1dab   :  { %s3678_s5 = scalar_lea.vmem %s2666_s25, 16  ;;  %s3682_s10 = scalar_lea.vmem %s2666_s25, 32 }
0x1dac   :  { %p3679_p8 = scmp.ne.s32.totalorder %s2666_s25, %s3678_s5  ;;  %p3683_p9 = scmp.lt.s32.totalorder %s2666_s25, %s2666_s25 }
0x1dad   :  { %p3684_p10 = scmp.lt.s32.totalorder %s3682_s10, %s3678_s5 }
0x1daf   :  { %p3685_p11 = por %p3684_p10, %p3683_p9 }
0x1db1   :  { %p3686_p12 = pnand %p3685_p11, %p3679_p8 }
0x1e2d   :  { %v2633_v23 = vpop.xlane.xlu0 %2632 }
0x1e2e   :  { %v2634_v29 = vrot.slane %v2633_v23, 4 }
0x1e30   :  { %v2635_v54 = vadd.f32 %v2634_v29, %v2633_v23 }
0x1e32   :  { %v2636_v55 = vrot.slane %v2635_v54, 2 }
0x1e34   :  { %v2637_v56 = vadd.f32 %v2636_v55, %v2635_v54 }
0x1e36   :  { %v2638_v57 = vrot.slane %v2637_v56, 1 }
0x1e38   :  { %v2639_v48 = vadd.f32 %v2638_v57, %v2637_v56 }
0x1e3a   :  { %3525 = vpush %v2639_v48 }
0x1e6b   :  { %s3526_s4 = spop %3525 }
0x1e6c   :  { %s2641_s23 = ssub.f32 0.0, %s3526_s4 }
0x1e6e   :  { %s2644_s7 = smul.f32 0.5, %s2641_s23 }
0x1e70   :  { %v2646_v51 = vstv %s2644_s7 }
0x1e71   :  { %2648 = vst.msk [vmem:[#allocation4] sm:$0x1] %vm2647_vm6, %v2646_v51 }
0x1e72   :  { %3689 = shalt.err (!%p3686_p12)
}
0x1e73   :  { %s3690_s27 = scalar_lea.hbm %s4515_s11, 16 }
0x1e74   :  { %p3691_p13 = scmp.ne.s32.totalorder %s4515_s11, %s3690_s27  ;;  %p3694_p0 = scmp.lt.u32.totalorder %s3690_s27, %s4515_s11 }
0x1e76   :  { %p3696_p1 = pnand %p3694_p0, %p3691_p13 }
0x1e78   :  { %3699 = shalt.err (!%p3696_p1)
}
0x1e79   :  { %2668 = dma.vmem_to_hbm [thread:$0]  %s2666_s25, 16, %s4515_s11, [#allocation5]  }
0x1e7a   :  { %3700 = dma.done.wait [#allocation3], 32  }
0x1e7b   :  { %3701 = vsyncadd [#allocation3], 4294967264 }
0x1e7c   :  { %3702 = dma.done.wait [#allocation5], 16  }
0x1e7d   :  { %3703 = vsyncadd [#allocation5], 4294967280 }
0x1e7e   :  { %2675 = vsyncpa [#allocation3], 1 }
0x1e7f   :  { %2676 = vsyncpa [#allocation5], 1 }

</bundles_post_ra>
